<compile_context>
chip_gen: v7x
topology: tpu7x:2x2x1
jax: 0.10.0
libtpu: 0.0.40
codegen_flags: <defaults>
</compile_context>

<pallas_src>
import functools
import math

import jax
import jax.numpy as jnp
from jax.experimental import pallas as pl
from jax.experimental.pallas import tpu as pltpu

_VMEM_LIMIT = 32 * 1024 * 1024  # safe on v5e/v6e/v7x; demo tiles are tiny anyway


def _pick_row_tile(rows, preferred=256):
    """Largest 8-aligned tile <= preferred that divides rows."""
    for t in (preferred, 128, 64, 32, 16, 8):
        if t <= rows and rows % t == 0:
            return t
    return rows


# ---------------------------------------------------------------------------
# Kernels
# ---------------------------------------------------------------------------

def _linear_rms_kernel(x_ref, w_ref, b_ref, g_ref, o_ref, *, eps):
    # bf16 operands on the MXU, f32 accumulation.
    h = jnp.dot(x_ref[...], w_ref[...], preferred_element_type=jnp.float32)
    h = h + b_ref[...].astype(jnp.float32)
    ms = jnp.mean(h * h, axis=-1, keepdims=True)
    hn = (h * jax.lax.rsqrt(ms + eps)).astype(o_ref.dtype)
    o_ref[...] = hn * g_ref[...]


def _kv_proj_kernel(x_ref, wk_ref, bk_ref, gk_ref, wv_ref, bv_ref,
                    k_ref, v_ref, *, eps):
    xv = x_ref[...]                                   # bf16 tile, reused twice
    k = jnp.dot(xv, wk_ref[...], preferred_element_type=jnp.float32)
    k = k + bk_ref[...].astype(jnp.float32)
    ms = jnp.mean(k * k, axis=-1, keepdims=True)
    k_ref[...] = (k * jax.lax.rsqrt(ms + eps)).astype(k_ref.dtype) * gk_ref[...]

    v = jnp.dot(xv, wv_ref[...], preferred_element_type=jnp.float32)
    v = v + bv_ref[...].astype(jnp.float32)
    v_ref[...] = v.astype(v_ref.dtype)


def _linear_kernel(x_ref, w_ref, b_ref, o_ref):
    h = jnp.dot(x_ref[...], w_ref[...], preferred_element_type=jnp.float32)
    h = h + b_ref[...].astype(jnp.float32)
    o_ref[...] = h.astype(o_ref.dtype)


def _attn_kernel(q_ref, k_ref, v_ref, o_ref, *, scale):
    q = q_ref[0]                                      # (tq, hd) bf16
    k = k_ref[0]                                      # (skv, hd) bf16
    v = v_ref[0]                                      # (skv, hd) bf16
    s = jax.lax.dot_general(
        q, k, dimension_numbers=(((1,), (1,)), ((), ())),
        preferred_element_type=jnp.float32) * scale   # (tq, skv) f32
    m = jnp.max(s, axis=-1, keepdims=True)
    p = jnp.exp(s - m)
    l = jnp.sum(p, axis=-1, keepdims=True)
    p = p * pl.reciprocal(l, approx=True)
    o = jnp.dot(p.astype(v.dtype), v, preferred_element_type=jnp.float32)
    o_ref[0] = o.astype(o_ref.dtype)


# ---------------------------------------------------------------------------
# pallas_call wrappers
# ---------------------------------------------------------------------------

def _linear_rms(x2, w_t, b, g, *, eps, tm):
    rows, din = x2.shape
    dout = w_t.shape[1]
    flops = 2 * rows * din * dout
    bytes_accessed = 2 * (rows * din + din * dout + rows * dout + 2 * dout)
    return pl.pallas_call(
        functools.partial(_linear_rms_kernel, eps=eps),
        out_shape=jax.ShapeDtypeStruct((rows, dout), x2.dtype),
        grid=(rows // tm,),
        in_specs=[
            pl.BlockSpec((tm, din), lambda i: (i, 0)),
            pl.BlockSpec((din, dout), lambda i: (0, 0)),
            pl.BlockSpec((1, dout), lambda i: (0, 0)),
            pl.BlockSpec((1, dout), lambda i: (0, 0)),
        ],
        out_specs=pl.BlockSpec((tm, dout), lambda i: (i, 0)),
        compiler_params=pltpu.CompilerParams(
            dimension_semantics=("parallel",),
            vmem_limit_bytes=_VMEM_LIMIT),
        cost_estimate=pl.CostEstimate(flops=flops, transcendentals=0,
                                      bytes_accessed=bytes_accessed),
    )(x2, w_t, b, g)


def _kv_proj(y2, wk_t, bk, gk, wv_t, bv, *, eps, tm):
    rows, din = y2.shape
    dout = wk_t.shape[1]
    flops = 4 * rows * din * dout
    bytes_accessed = 2 * (rows * din + 2 * din * dout + 2 * rows * dout + 3 * dout)
    return pl.pallas_call(
        functools.partial(_kv_proj_kernel, eps=eps),
        out_shape=(jax.ShapeDtypeStruct((rows, dout), y2.dtype),
                   jax.ShapeDtypeStruct((rows, dout), y2.dtype)),
        grid=(rows // tm,),
        in_specs=[
            pl.BlockSpec((tm, din), lambda i: (i, 0)),
            pl.BlockSpec((din, dout), lambda i: (0, 0)),
            pl.BlockSpec((1, dout), lambda i: (0, 0)),
            pl.BlockSpec((1, dout), lambda i: (0, 0)),
            pl.BlockSpec((din, dout), lambda i: (0, 0)),
            pl.BlockSpec((1, dout), lambda i: (0, 0)),
        ],
        out_specs=(pl.BlockSpec((tm, dout), lambda i: (i, 0)),
                   pl.BlockSpec((tm, dout), lambda i: (i, 0))),
        compiler_params=pltpu.CompilerParams(
            dimension_semantics=("parallel",),
            vmem_limit_bytes=_VMEM_LIMIT),
        cost_estimate=pl.CostEstimate(flops=flops, transcendentals=0,
                                      bytes_accessed=bytes_accessed),
    )(y2, wk_t, bk, gk, wv_t, bv)


def _linear(x2, w_t, b, *, tm):
    rows, din = x2.shape
    dout = w_t.shape[1]
    flops = 2 * rows * din * dout
    bytes_accessed = 2 * (rows * din + din * dout + rows * dout + dout)
    return pl.pallas_call(
        _linear_kernel,
        out_shape=jax.ShapeDtypeStruct((rows, dout), x2.dtype),
        grid=(rows // tm,),
        in_specs=[
            pl.BlockSpec((tm, din), lambda i: (i, 0)),
            pl.BlockSpec((din, dout), lambda i: (0, 0)),
            pl.BlockSpec((1, dout), lambda i: (0, 0)),
        ],
        out_specs=pl.BlockSpec((tm, dout), lambda i: (i, 0)),
        compiler_params=pltpu.CompilerParams(
            dimension_semantics=("parallel",),
            vmem_limit_bytes=_VMEM_LIMIT),
        cost_estimate=pl.CostEstimate(flops=flops, transcendentals=0,
                                      bytes_accessed=bytes_accessed),
    )(x2, w_t, b)


def _attention(qh, kh, vh, *, tq):
    bh, sq, hd = qh.shape
    skv = kh.shape[1]
    scale = 1.0 / math.sqrt(hd)
    return pl.pallas_call(
        functools.partial(_attn_kernel, scale=scale),
        out_shape=jax.ShapeDtypeStruct((bh, sq, hd), qh.dtype),
        grid=(bh, sq // tq),
        in_specs=[
            pl.BlockSpec((1, tq, hd), lambda b, i: (b, i, 0)),
            pl.BlockSpec((1, skv, hd), lambda b, i: (b, 0, 0)),
            pl.BlockSpec((1, skv, hd), lambda b, i: (b, 0, 0)),
        ],
        out_specs=pl.BlockSpec((1, tq, hd), lambda b, i: (b, i, 0)),
        compiler_params=pltpu.CompilerParams(
            dimension_semantics=("parallel", "parallel"),
            vmem_limit_bytes=_VMEM_LIMIT),
    )(qh, kh, vh)


# ---------------------------------------------------------------------------
# Full forward
# ---------------------------------------------------------------------------

@functools.partial(jax.jit, static_argnames=("num_heads", "eps"))
def cross_attention_pallas(x, y, params, *, num_heads, eps=1e-6):
    """x: (B, Sq, D) bf16 queries; y: (B, Skv, D) bf16 context -> (B, Sq, D)."""
    wq_t, bq, gq, wk_t, bk, gk, wv_t, bv, wo_t, bo = params
    batch, sq, dim = x.shape
    skv = y.shape[1]
    hd = dim // num_heads

    x2 = x.reshape(batch * sq, dim)
    y2 = y.reshape(batch * skv, dim)

    tm_q = _pick_row_tile(batch * sq)
    tm_kv = _pick_row_tile(batch * skv)

    q2 = _linear_rms(x2, wq_t, bq, gq, eps=eps, tm=tm_q)
    k2, v2 = _kv_proj(y2, wk_t, bk, gk, wv_t, bv, eps=eps, tm=tm_kv)

    def split_heads(t2, seq):
        return (t2.reshape(batch, seq, num_heads, hd)
                  .transpose(0, 2, 1, 3)
                  .reshape(batch * num_heads, seq, hd))

    qh = split_heads(q2, sq)
    kh = split_heads(k2, skv)
    vh = split_heads(v2, skv)

    tq = _pick_row_tile(sq, preferred=256)
    oh = _attention(qh, kh, vh, tq=tq)

    o2 = (oh.reshape(batch, num_heads, sq, hd)
            .transpose(0, 2, 1, 3)
            .reshape(batch * sq, dim))

    out2 = _linear(o2, wo_t, bo, tm=tm_q)
    return out2.reshape(batch, sq, dim)


# ---------------------------------------------------------------------------
# Parameters + pure-JAX reference
# ---------------------------------------------------------------------------

def init_params(key, dim, dtype=jnp.bfloat16):
    """Synthetic params matching nn.Linear (stored transposed) + RMSNorm."""
    keys = jax.random.split(key, 10)
    scale = 1.0 / math.sqrt(dim)

    def lin(kw, kb):
        w_t = (jax.random.normal(kw, (dim, dim)) * scale).astype(dtype)  # (in, out)
        b = (0.02 * jax.random.normal(kb, (1, dim))).astype(dtype)
        return w_t, b

    wq_t, bq = lin(keys[0], keys[1])
    wk_t, bk = lin(keys[2], keys[3])
    wv_t, bv = lin(keys[4], keys[5])
    wo_t, bo = lin(keys[6], keys[7])
    gq = (1.0 + 0.05 * jax.random.normal(keys[8], (1, dim))).astype(dtype)
    gk = (1.0 + 0.05 * jax.random.normal(keys[9], (1, dim))).astype(dtype)
    return (wq_t, bq, gq, wk_t, bk, gk, wv_t, bv, wo_t, bo)


def cross_attention_ref(x, y, params, *, num_heads, eps=1e-6):
    f32 = jnp.float32
    wq, bq, gq, wk, bk, gk, wv, bv, wo, bo = [p.astype(f32) for p in params]
    xf = x.astype(f32)
    yf = y.astype(f32)

    def rms(h, g):
        ms = jnp.mean(h * h, axis=-1, keepdims=True)
        return h * jax.lax.rsqrt(ms + eps) * g

    q = rms(xf @ wq + bq[0], gq[0])
    k = rms(yf @ wk + bk[0], gk[0])
    v = yf @ wv + bv[0]

    b, sq, dim = x.shape
    skv = y.shape[1]
    hd = dim // num_heads

    def heads(t, s):
        return t.reshape(b, s, num_heads, hd).transpose(0, 2, 1, 3)

    qh, kh, vh = heads(q, sq), heads(k, skv), heads(v, skv)
    s = jnp.einsum('bhqd,bhkd->bhqk', qh, kh) * (1.0 / math.sqrt(hd))
    p = jax.nn.softmax(s, axis=-1)
    o = jnp.einsum('bhqk,bhkd->bhqd', p, vh)
    o = o.transpose(0, 2, 1, 3).reshape(b, sq, dim)
    return (o @ wo + bo[0]).astype(jnp.bfloat16)


if __name__ == "__main__":
    batch, seq_q, seq_kv = 2, 16, 8
    dim, num_heads = 256, 2          # head_dim = 128 -> lane-dense attention blocks

    key = jax.random.PRNGKey(0)
    kx, ky, kp = jax.random.split(key, 3)
    x = jax.random.normal(kx, (batch, seq_q, dim), dtype=jnp.float32).astype(jnp.bfloat16)
    y = jax.random.normal(ky, (batch, seq_kv, dim), dtype=jnp.float32).astype(jnp.bfloat16)
    params = init_params(kp, dim)

    out = cross_attention_pallas(x, y, params, num_heads=num_heads, eps=1e-6)
    out = jax.block_until_ready(out)

    ref = cross_attention_ref(x, y, params, num_heads=num_heads, eps=1e-6)
    err = float(jnp.max(jnp.abs(out.astype(jnp.float32) - ref.astype(jnp.float32))))
    assert out.shape == (batch, seq_q, dim)
    assert out.dtype == jnp.bfloat16
    assert err < 5e-2, f"mismatch vs reference: {err}"

    print("KERNEL_OK")
</pallas_src>

<mosaic_0001>
module attributes {stable_mosaic.version = 11 : i64} {
  func.func @_linear_rms_kernel(%arg0: i32, %arg1: memref<32x256xbf16, #tpu.memory_space<vmem>>, %arg2: memref<256x256xbf16, #tpu.memory_space<vmem>>, %arg3: memref<1x256xbf16, #tpu.memory_space<vmem>>, %arg4: memref<1x256xbf16, #tpu.memory_space<vmem>>, %arg5: memref<32x256xbf16, #tpu.memory_space<vmem>>) attributes {dimension_semantics = [#tpu.dimension_semantics<parallel>], iteration_bounds = array<i64: 1>, scalar_prefetch = 0 : i64, scratch_operands = 0 : i64, tpu.core_type = #tpu.core_type<tc>, window_params = [{transform_indices = @transform_0, window_bounds = array<i64: 32, 256>}, {pipeline_mode = #tpu.pipeline_mode<synchronous>, transform_indices = @transform_1, window_bounds = array<i64: 256, 256>}, {pipeline_mode = #tpu.pipeline_mode<synchronous>, transform_indices = @transform_2, window_bounds = array<i64: 1, 256>}, {pipeline_mode = #tpu.pipeline_mode<synchronous>, transform_indices = @transform_3, window_bounds = array<i64: 1, 256>}, {transform_indices = @transform_4, window_bounds = array<i64: 32, 256>}]} {
    %c0 = arith.constant 0 : index
    %c0_0 = arith.constant 0 : index
    %0 = vector.load %arg1[%c0, %c0_0] : memref<32x256xbf16, #tpu.memory_space<vmem>>, vector<32x256xbf16>
    %c0_1 = arith.constant 0 : index
    %c0_2 = arith.constant 0 : index
    %1 = vector.load %arg2[%c0_1, %c0_2] : memref<256x256xbf16, #tpu.memory_space<vmem>>, vector<256x256xbf16>
    %cst = arith.constant dense<0.000000e+00> : vector<32x256xf32>
    %2 = tpu.matmul %0, %1, %cst {dimension_numbers = #tpu.dot_dimension_numbers<[1], [0], [0], [1], [0, 0, 1, 1], [], []>} : vector<32x256xbf16>, vector<256x256xbf16>, vector<32x256xf32> -> vector<32x256xf32>
    %c0_3 = arith.constant 0 : index
    %c0_4 = arith.constant 0 : index
    %3 = vector.load %arg3[%c0_3, %c0_4] : memref<1x256xbf16, #tpu.memory_space<vmem>>, vector<1x256xbf16>
    %4 = arith.extf %3 : vector<1x256xbf16> to vector<1x256xf32>
    %5 = vector.broadcast %4 : vector<1x256xf32> to vector<32x256xf32>
    %6 = arith.addf %2, %5 : vector<32x256xf32>
    %7 = arith.mulf %6, %6 : vector<32x256xf32>
    %cst_5 = arith.constant dense<0.000000e+00> : vector<32xf32>
    %8 = vector.multi_reduction <add>, %7, %cst_5 [1] : vector<32x256xf32> to vector<32xf32>
    %9 = vector.shape_cast %8 : vector<32xf32> to vector<32x1xf32>
    %cst_6 = arith.constant 2.560000e+02 : f32
    %10 = vector.broadcast %cst_6 : f32 to vector<32x1xf32>
    %11 = arith.divf %9, %10 : vector<32x1xf32>
    %cst_7 = arith.constant 9.99999997E-7 : f32
    %12 = vector.broadcast %cst_7 : f32 to vector<32x1xf32>
    %13 = arith.addf %11, %12 : vector<32x1xf32>
    %14 = math.rsqrt %13 : vector<32x1xf32>
    %15 = vector.broadcast %14 : vector<32x1xf32> to vector<32x256xf32>
    %16 = arith.mulf %6, %15 : vector<32x256xf32>
    %17 = arith.truncf %16 : vector<32x256xf32> to vector<32x256xbf16>
    %c0_8 = arith.constant 0 : index
    %c0_9 = arith.constant 0 : index
    %18 = vector.load %arg4[%c0_8, %c0_9] : memref<1x256xbf16, #tpu.memory_space<vmem>>, vector<1x256xbf16>
    %19 = vector.broadcast %18 : vector<1x256xbf16> to vector<32x256xbf16>
    %20 = arith.mulf %17, %19 : vector<32x256xbf16>
    %c0_10 = arith.constant 0 : index
    %c0_11 = arith.constant 0 : index
    %21 = vector.load %arg5[%c0_10, %c0_11] : memref<32x256xbf16, #tpu.memory_space<vmem>>, vector<32x256xbf16>
    tpu.vector_store %arg5[%c0_10, %c0_11], %20 {strides = array<i32>} : memref<32x256xbf16, #tpu.memory_space<vmem>>, vector<32x256xbf16>,
    return
  }
  func.func @transform_0(%arg0: i32) -> (i32, i32) {
    %c0_i32 = arith.constant 0 : i32
    %c0_i32_0 = arith.constant 0 : i32
    return %arg0, %c0_i32 : i32, i32
  }
  func.func @transform_1(%arg0: i32) -> (i32, i32) {
    %c0_i32 = arith.constant 0 : i32
    %c0_i32_0 = arith.constant 0 : i32
    %c0_i32_1 = arith.constant 0 : i32
    return %c0_i32, %c0_i32_0 : i32, i32
  }
  func.func @transform_2(%arg0: i32) -> (i32, i32) {
    %c0_i32 = arith.constant 0 : i32
    %c0_i32_0 = arith.constant 0 : i32
    %c0_i32_1 = arith.constant 0 : i32
    return %c0_i32, %c0_i32_0 : i32, i32
  }
  func.func @transform_3(%arg0: i32) -> (i32, i32) {
    %c0_i32 = arith.constant 0 : i32
    %c0_i32_0 = arith.constant 0 : i32
    %c0_i32_1 = arith.constant 0 : i32
    return %c0_i32, %c0_i32_0 : i32, i32
  }
  func.func @transform_4(%arg0: i32) -> (i32, i32) {
    %c0_i32 = arith.constant 0 : i32
    %c0_i32_0 = arith.constant 0 : i32
    return %arg0, %c0_i32 : i32, i32
  }
}

module attributes {stable_mosaic.version = 11 : i64} {
  func.func @_kv_proj_kernel(%arg0: i32, %arg1: memref<16x256xbf16, #tpu.memory_space<vmem>>, %arg2: memref<256x256xbf16, #tpu.memory_space<vmem>>, %arg3: memref<1x256xbf16, #tpu.memory_space<vmem>>, %arg4: memref<1x256xbf16, #tpu.memory_space<vmem>>, %arg5: memref<256x256xbf16, #tpu.memory_space<vmem>>, %arg6: memref<1x256xbf16, #tpu.memory_space<vmem>>, %arg7: memref<16x256xbf16, #tpu.memory_space<vmem>>, %arg8: memref<16x256xbf16, #tpu.memory_space<vmem>>) attributes {dimension_semantics = [#tpu.dimension_semantics<parallel>], iteration_bounds = array<i64: 1>, scalar_prefetch = 0 : i64, scratch_operands = 0 : i64, tpu.core_type = #tpu.core_type<tc>, window_params = [{transform_indices = @transform_0, window_bounds = array<i64: 16, 256>}, {pipeline_mode = #tpu.pipeline_mode<synchronous>, transform_indices = @transform_1, window_bounds = array<i64: 256, 256>}, {pipeline_mode = #tpu.pipeline_mode<synchronous>, transform_indices = @transform_2, window_bounds = array<i64: 1, 256>}, {pipeline_mode = #tpu.pipeline_mode<synchronous>, transform_indices = @transform_3, window_bounds = array<i64: 1, 256>}, {pipeline_mode = #tpu.pipeline_mode<synchronous>, transform_indices = @transform_4, window_bounds = array<i64: 256, 256>}, {pipeline_mode = #tpu.pipeline_mode<synchronous>, transform_indices = @transform_5, window_bounds = array<i64: 1, 256>}, {transform_indices = @transform_6, window_bounds = array<i64: 16, 256>}, {transform_indices = @transform_7, window_bounds = array<i64: 16, 256>}]} {
    %c0 = arith.constant 0 : index
    %c0_0 = arith.constant 0 : index
    %0 = vector.load %arg1[%c0, %c0_0] : memref<16x256xbf16, #tpu.memory_space<vmem>>, vector<16x256xbf16>
    %c0_1 = arith.constant 0 : index
    %c0_2 = arith.constant 0 : index
    %1 = vector.load %arg2[%c0_1, %c0_2] : memref<256x256xbf16, #tpu.memory_space<vmem>>, vector<256x256xbf16>
    %cst = arith.constant dense<0.000000e+00> : vector<16x256xf32>
    %2 = tpu.matmul %0, %1, %cst {dimension_numbers = #tpu.dot_dimension_numbers<[1], [0], [0], [1], [0, 0, 1, 1], [], []>} : vector<16x256xbf16>, vector<256x256xbf16>, vector<16x256xf32> -> vector<16x256xf32>
    %c0_3 = arith.constant 0 : index
    %c0_4 = arith.constant 0 : index
    %3 = vector.load %arg3[%c0_3, %c0_4] : memref<1x256xbf16, #tpu.memory_space<vmem>>, vector<1x256xbf16>
    %4 = arith.extf %3 : vector<1x256xbf16> to vector<1x256xf32>
    %5 = vector.broadcast %4 : vector<1x256xf32> to vector<16x256xf32>
    %6 = arith.addf %2, %5 : vector<16x256xf32>
    %7 = arith.mulf %6, %6 : vector<16x256xf32>
    %cst_5 = arith.constant dense<0.000000e+00> : vector<16xf32>
    %8 = vector.multi_reduction <add>, %7, %cst_5 [1] : vector<16x256xf32> to vector<16xf32>
    %9 = vector.shape_cast %8 : vector<16xf32> to vector<16x1xf32>
    %cst_6 = arith.constant 2.560000e+02 : f32
    %10 = vector.broadcast %cst_6 : f32 to vector<16x1xf32>
    %11 = arith.divf %9, %10 : vector<16x1xf32>
    %cst_7 = arith.constant 9.99999997E-7 : f32
    %12 = vector.broadcast %cst_7 : f32 to vector<16x1xf32>
    %13 = arith.addf %11, %12 : vector<16x1xf32>
    %14 = math.rsqrt %13 : vector<16x1xf32>
    %15 = vector.broadcast %14 : vector<16x1xf32> to vector<16x256xf32>
    %16 = arith.mulf %6, %15 : vector<16x256xf32>
    %17 = arith.truncf %16 : vector<16x256xf32> to vector<16x256xbf16>
    %c0_8 = arith.constant 0 : index
    %c0_9 = arith.constant 0 : index
    %18 = vector.load %arg4[%c0_8, %c0_9] : memref<1x256xbf16, #tpu.memory_space<vmem>>, vector<1x256xbf16>
    %19 = vector.broadcast %18 : vector<1x256xbf16> to vector<16x256xbf16>
    %20 = arith.mulf %17, %19 : vector<16x256xbf16>
    %c0_10 = arith.constant 0 : index
    %c0_11 = arith.constant 0 : index
    %21 = vector.load %arg7[%c0_10, %c0_11] : memref<16x256xbf16, #tpu.memory_space<vmem>>, vector<16x256xbf16>
    tpu.vector_store %arg7[%c0_10, %c0_11], %20 {strides = array<i32>} : memref<16x256xbf16, #tpu.memory_space<vmem>>, vector<16x256xbf16>,
    %c0_12 = arith.constant 0 : index
    %c0_13 = arith.constant 0 : index
    %22 = vector.load %arg5[%c0_12, %c0_13] : memref<256x256xbf16, #tpu.memory_space<vmem>>, vector<256x256xbf16>
    %cst_14 = arith.constant dense<0.000000e+00> : vector<16x256xf32>
    %23 = tpu.matmul %0, %22, %cst_14 {dimension_numbers = #tpu.dot_dimension_numbers<[1], [0], [0], [1], [0, 0, 1, 1], [], []>} : vector<16x256xbf16>, vector<256x256xbf16>, vector<16x256xf32> -> vector<16x256xf32>
    %c0_15 = arith.constant 0 : index
    %c0_16 = arith.constant 0 : index
    %24 = vector.load %arg6[%c0_15, %c0_16] : memref<1x256xbf16, #tpu.memory_space<vmem>>, vector<1x256xbf16>
    %25 = arith.extf %24 : vector<1x256xbf16> to vector<1x256xf32>
    %26 = vector.broadcast %25 : vector<1x256xf32> to vector<16x256xf32>
    %27 = arith.addf %23, %26 : vector<16x256xf32>
    %28 = arith.truncf %27 : vector<16x256xf32> to vector<16x256xbf16>
    %c0_17 = arith.constant 0 : index
    %c0_18 = arith.constant 0 : index
    %29 = vector.load %arg8[%c0_17, %c0_18] : memref<16x256xbf16, #tpu.memory_space<vmem>>, vector<16x256xbf16>
    tpu.vector_store %arg8[%c0_17, %c0_18], %28 {strides = array<i32>} : memref<16x256xbf16, #tpu.memory_space<vmem>>, vector<16x256xbf16>,
    return
  }
  func.func @transform_0(%arg0: i32) -> (i32, i32) {
    %c0_i32 = arith.constant 0 : i32
    %c0_i32_0 = arith.constant 0 : i32
    return %arg0, %c0_i32 : i32, i32
  }
  func.func @transform_1(%arg0: i32) -> (i32, i32) {
    %c0_i32 = arith.constant 0 : i32
    %c0_i32_0 = arith.constant 0 : i32
    %c0_i32_1 = arith.constant 0 : i32
    return %c0_i32, %c0_i32_0 : i32, i32
  }
  func.func @transform_2(%arg0: i32) -> (i32, i32) {
    %c0_i32 = arith.constant 0 : i32
    %c0_i32_0 = arith.constant 0 : i32
    %c0_i32_1 = arith.constant 0 : i32
    return %c0_i32, %c0_i32_0 : i32, i32
  }
  func.func @transform_3(%arg0: i32) -> (i32, i32) {
    %c0_i32 = arith.constant 0 : i32
    %c0_i32_0 = arith.constant 0 : i32
    %c0_i32_1 = arith.constant 0 : i32
    return %c0_i32, %c0_i32_0 : i32, i32
  }
  func.func @transform_4(%arg0: i32) -> (i32, i32) {
    %c0_i32 = arith.constant 0 : i32
    %c0_i32_0 = arith.constant 0 : i32
    %c0_i32_1 = arith.constant 0 : i32
    return %c0_i32, %c0_i32_0 : i32, i32
  }
  func.func @transform_5(%arg0: i32) -> (i32, i32) {
    %c0_i32 = arith.constant 0 : i32
    %c0_i32_0 = arith.constant 0 : i32
    %c0_i32_1 = arith.constant 0 : i32
    return %c0_i32, %c0_i32_0 : i32, i32
  }
  func.func @transform_6(%arg0: i32) -> (i32, i32) {
    %c0_i32 = arith.constant 0 : i32
    %c0_i32_0 = arith.constant 0 : i32
    return %arg0, %c0_i32 : i32, i32
  }
  func.func @transform_7(%arg0: i32) -> (i32, i32) {
    %c0_i32 = arith.constant 0 : i32
    %c0_i32_0 = arith.constant 0 : i32
    return %arg0, %c0_i32 : i32, i32
  }
}

module attributes {stable_mosaic.version = 11 : i64} {
  func.func @_attn_kernel(%arg0: i32, %arg1: i32, %arg2: memref<1x16x128xbf16, #tpu.memory_space<vmem>>, %arg3: memref<1x8x128xbf16, #tpu.memory_space<vmem>>, %arg4: memref<1x8x128xbf16, #tpu.memory_space<vmem>>, %arg5: memref<1x16x128xbf16, #tpu.memory_space<vmem>>) attributes {dimension_semantics = [#tpu.dimension_semantics<parallel>, #tpu.dimension_semantics<parallel>], iteration_bounds = array<i64: 4, 1>, scalar_prefetch = 0 : i64, scratch_operands = 0 : i64, tpu.core_type = #tpu.core_type<tc>, window_params = [{transform_indices = @transform_0, window_bounds = array<i64: 1, 16, 128>}, {transform_indices = @transform_1, window_bounds = array<i64: 1, 8, 128>}, {transform_indices = @transform_2, window_bounds = array<i64: 1, 8, 128>}, {transform_indices = @transform_3, window_bounds = array<i64: 1, 16, 128>}]} {
    %c0 = arith.constant 0 : index
    %c0_0 = arith.constant 0 : index
    %c0_1 = arith.constant 0 : index
    %0 = vector.load %arg2[%c0, %c0_0, %c0_1] : memref<1x16x128xbf16, #tpu.memory_space<vmem>>, vector<1x16x128xbf16>
    %1 = vector.shape_cast %0 : vector<1x16x128xbf16> to vector<16x128xbf16>
    %c0_2 = arith.constant 0 : index
    %c0_3 = arith.constant 0 : index
    %c0_4 = arith.constant 0 : index
    %2 = vector.load %arg3[%c0_2, %c0_3, %c0_4] : memref<1x8x128xbf16, #tpu.memory_space<vmem>>, vector<1x8x128xbf16>
    %3 = vector.shape_cast %2 : vector<1x8x128xbf16> to vector<8x128xbf16>
    %c0_5 = arith.constant 0 : index
    %c0_6 = arith.constant 0 : index
    %c0_7 = arith.constant 0 : index
    %4 = vector.load %arg4[%c0_5, %c0_6, %c0_7] : memref<1x8x128xbf16, #tpu.memory_space<vmem>>, vector<1x8x128xbf16>
    %5 = vector.shape_cast %4 : vector<1x8x128xbf16> to vector<8x128xbf16>
    %cst = arith.constant dense<0.000000e+00> : vector<16x8xf32>
    %6 = tpu.matmul %1, %3, %cst {dimension_numbers = #tpu.dot_dimension_numbers<[1], [1], [0], [0], [0, 0, 1, 0], [], []>} : vector<16x128xbf16>, vector<8x128xbf16>, vector<16x8xf32> -> vector<16x8xf32>
    %cst_8 = arith.constant 0.0883883461 : f32
    %7 = vector.broadcast %cst_8 : f32 to vector<16x8xf32>
    %8 = arith.mulf %6, %7 : vector<16x8xf32>
    %cst_9 = arith.constant dense<0xFF800000> : vector<16xf32>
    %9 = vector.multi_reduction <maximumf>, %8, %cst_9 [1] : vector<16x8xf32> to vector<16xf32>
    %10 = vector.shape_cast %9 : vector<16xf32> to vector<16x1xf32>
    %11 = vector.broadcast %10 : vector<16x1xf32> to vector<16x8xf32>
    %12 = arith.subf %8, %11 : vector<16x8xf32>
    %13 = math.exp %12 : vector<16x8xf32>
    %cst_10 = arith.constant dense<0.000000e+00> : vector<16xf32>
    %14 = vector.multi_reduction <add>, %13, %cst_10 [1] : vector<16x8xf32> to vector<16xf32>
    %15 = vector.shape_cast %14 : vector<16xf32> to vector<16x1xf32>
    %16 = tpu.reciprocal %15 {approx = true} : vector<16x1xf32> -> vector<16x1xf32>
    %17 = vector.broadcast %16 : vector<16x1xf32> to vector<16x8xf32>
    %18 = arith.mulf %13, %17 : vector<16x8xf32>
    %19 = arith.truncf %18 : vector<16x8xf32> to vector<16x8xbf16>
    %cst_11 = arith.constant dense<0.000000e+00> : vector<16x128xf32>
    %20 = tpu.matmul %19, %5, %cst_11 {dimension_numbers = #tpu.dot_dimension_numbers<[1], [0], [0], [1], [0, 0, 1, 1], [], []>} : vector<16x8xbf16>, vector<8x128xbf16>, vector<16x128xf32> -> vector<16x128xf32>
    %21 = arith.truncf %20 : vector<16x128xf32> to vector<16x128xbf16>
    %c0_12 = arith.constant 0 : index
    %c0_13 = arith.constant 0 : index
    %c0_14 = arith.constant 0 : index
    %22 = vector.load %arg5[%c0_12, %c0_13, %c0_14] : memref<1x16x128xbf16, #tpu.memory_space<vmem>>, vector<1x16x128xbf16>
    %23 = vector.shape_cast %22 : vector<1x16x128xbf16> to vector<16x128xbf16>
    %24 = vector.shape_cast %21 : vector<16x128xbf16> to vector<1x16x128xbf16>
    tpu.vector_store %arg5[%c0_12, %c0_13, %c0_14], %24 {strides = array<i32>} : memref<1x16x128xbf16, #tpu.memory_space<vmem>>, vector<1x16x128xbf16>,
    return
  }
  func.func @transform_0(%arg0: i32, %arg1: i32) -> (i32, i32, i32) {
    %c0_i32 = arith.constant 0 : i32
    %c0_i32_0 = arith.constant 0 : i32
    return %arg0, %arg1, %c0_i32 : i32, i32, i32
  }
  func.func @transform_1(%arg0: i32, %arg1: i32) -> (i32, i32, i32) {
    %c0_i32 = arith.constant 0 : i32
    %c0_i32_0 = arith.constant 0 : i32
    %c0_i32_1 = arith.constant 0 : i32
    return %arg0, %c0_i32, %c0_i32_0 : i32, i32, i32
  }
  func.func @transform_2(%arg0: i32, %arg1: i32) -> (i32, i32, i32) {
    %c0_i32 = arith.constant 0 : i32
    %c0_i32_0 = arith.constant 0 : i32
    %c0_i32_1 = arith.constant 0 : i32
    return %arg0, %c0_i32, %c0_i32_0 : i32, i32, i32
  }
  func.func @transform_3(%arg0: i32, %arg1: i32) -> (i32, i32, i32) {
    %c0_i32 = arith.constant 0 : i32
    %c0_i32_0 = arith.constant 0 : i32
    return %arg0, %arg1, %c0_i32 : i32, i32, i32
  }
}

module attributes {stable_mosaic.version = 11 : i64} {
  func.func @_linear_kernel(%arg0: i32, %arg1: memref<32x256xbf16, #tpu.memory_space<vmem>>, %arg2: memref<256x256xbf16, #tpu.memory_space<vmem>>, %arg3: memref<1x256xbf16, #tpu.memory_space<vmem>>, %arg4: memref<32x256xbf16, #tpu.memory_space<vmem>>) attributes {dimension_semantics = [#tpu.dimension_semantics<parallel>], iteration_bounds = array<i64: 1>, scalar_prefetch = 0 : i64, scratch_operands = 0 : i64, tpu.core_type = #tpu.core_type<tc>, window_params = [{transform_indices = @transform_0, window_bounds = array<i64: 32, 256>}, {pipeline_mode = #tpu.pipeline_mode<synchronous>, transform_indices = @transform_1, window_bounds = array<i64: 256, 256>}, {pipeline_mode = #tpu.pipeline_mode<synchronous>, transform_indices = @transform_2, window_bounds = array<i64: 1, 256>}, {transform_indices = @transform_3, window_bounds = array<i64: 32, 256>}]} {
    %c0 = arith.constant 0 : index
    %c0_0 = arith.constant 0 : index
    %0 = vector.load %arg1[%c0, %c0_0] : memref<32x256xbf16, #tpu.memory_space<vmem>>, vector<32x256xbf16>
    %c0_1 = arith.constant 0 : index
    %c0_2 = arith.constant 0 : index
    %1 = vector.load %arg2[%c0_1, %c0_2] : memref<256x256xbf16, #tpu.memory_space<vmem>>, vector<256x256xbf16>
    %cst = arith.constant dense<0.000000e+00> : vector<32x256xf32>
    %2 = tpu.matmul %0, %1, %cst {dimension_numbers = #tpu.dot_dimension_numbers<[1], [0], [0], [1], [0, 0, 1, 1], [], []>} : vector<32x256xbf16>, vector<256x256xbf16>, vector<32x256xf32> -> vector<32x256xf32>
    %c0_3 = arith.constant 0 : index
    %c0_4 = arith.constant 0 : index
    %3 = vector.load %arg3[%c0_3, %c0_4] : memref<1x256xbf16, #tpu.memory_space<vmem>>, vector<1x256xbf16>
    %4 = arith.extf %3 : vector<1x256xbf16> to vector<1x256xf32>
    %5 = vector.broadcast %4 : vector<1x256xf32> to vector<32x256xf32>
    %6 = arith.addf %2, %5 : vector<32x256xf32>
    %7 = arith.truncf %6 : vector<32x256xf32> to vector<32x256xbf16>
    %c0_5 = arith.constant 0 : index
    %c0_6 = arith.constant 0 : index
    %8 = vector.load %arg4[%c0_5, %c0_6] : memref<32x256xbf16, #tpu.memory_space<vmem>>, vector<32x256xbf16>
    tpu.vector_store %arg4[%c0_5, %c0_6], %7 {strides = array<i32>} : memref<32x256xbf16, #tpu.memory_space<vmem>>, vector<32x256xbf16>,
    return
  }
  func.func @transform_0(%arg0: i32) -> (i32, i32) {
    %c0_i32 = arith.constant 0 : i32
    %c0_i32_0 = arith.constant 0 : i32
    return %arg0, %c0_i32 : i32, i32
  }
  func.func @transform_1(%arg0: i32) -> (i32, i32) {
    %c0_i32 = arith.constant 0 : i32
    %c0_i32_0 = arith.constant 0 : i32
    %c0_i32_1 = arith.constant 0 : i32
    return %c0_i32, %c0_i32_0 : i32, i32
  }
  func.func @transform_2(%arg0: i32) -> (i32, i32) {
    %c0_i32 = arith.constant 0 : i32
    %c0_i32_0 = arith.constant 0 : i32
    %c0_i32_1 = arith.constant 0 : i32
    return %c0_i32, %c0_i32_0 : i32, i32
  }
  func.func @transform_3(%arg0: i32) -> (i32, i32) {
    %c0_i32 = arith.constant 0 : i32
    %c0_i32_0 = arith.constant 0 : i32
    return %arg0, %c0_i32 : i32, i32
  }
}

</mosaic_0001>

<bundles_post_ra>
// kernel: cross_attention_pallas.6
= control target key start
LH: loop header
LB: loop body
LE: loop exit
PB: predicated region body
PF: predicated region fallthrough
CT: control target
= control target key end

     0   :  { %s614_s12 = smov 0   ;;  %s616_s13 = smov 0   ;;  %s670_s0 = inlined_call_operand.vmem [shape: bf16[4,16,128], index: 0, kind: input, shape index: {}]   ;;  %s671_s1 = inlined_call_operand.vmem [shape: bf16[4,8,128], index: 1, kind: input, shape index: {}]   ;;  %s672_s2 = inlined_call_operand.vmem [shape: bf16[4,8,128], index: 2, kind: input, shape index: {}]   ;;  %s673_s3 = inlined_call_operand.vmem [shape: bf16[4,16,128], index: 3, kind: output, shape index: {}]  }
   0x1   :  { %s618_s14 = smov 0  }
   0x2 LB: > { %s25_s15 = sadd.s32 1, %s586_s13  ;;  %p495_p0 = scmp.ge.s32.totalorder %s590_s14, 1  ;;  %s590_s14 = sphi %s618_s14, %s13_s14   ;;  %s586_s13 = sphi %s616_s13, %s675_s13   ;;  %s582_s12 = sphi %s614_s12, %s674_s12  }
   0x3   : > { %p27_p1 = scmp.ge.s32.totalorder %s25_s15, 4  ;;  %p176_p2 = scmp.lt.s32.totalorder %s590_s14, 5 }
   0x5   : > { %s677_s15 = smov (%p27_p1, %s25_s15), 0  ;;  %p177_p3 = pnand %p495_p0, %p176_p2 }
   0x6   : > { %p217_p4 = scmp.lt.s32.totalorder (!%p177_p3), %s582_s12, 3  ;;  %v592_v0 = vmov (!%p177_p3), 0.0   ;;  %vm593_vm0 = vmmov (!%p177_p3), 0   ;;  %vm298_vm1 = vcmask (!%p177_p3), 64512   ;;  %vm325_vm2 = vcmask (!%p177_p3), 1043456  }
   0x7   : > { %180 = sbr.rel (%p177_p3) target bundleno = 776 (0x308), region = 32  ;;  %521 = vmatprep.subr.bf16.mxu0 (!%p177_p3), %v592_v0  ;;  %523 = vmatprep.mubr.msk.bf16.mxu0 (!%p177_p3), %vm593_vm0, %v592_v0 }
   0x8   : > { %527 = vmatprep.subr.bf16.mxu1 (!%p177_p3), %v592_v0  ;;  %529 = vmatprep.mubr.msk.bf16.mxu1 (!%p177_p3), %vm593_vm0, %v592_v0 }
   0xe   : > { %s679_s12 = smov (!%p217_p4, %s582_s12), 3 }
   0xf   : > { %s508_s16 = sshll.u32 %s679_s12, 3  ;;  %s498_s17 = sshll.u32 %s679_s12, 2 }
  0x10   : > { %s229_s20 = scalar_lea.vmem %s671_s1, %s498_s17  ;;  %s224_s23 = scalar_lea.vmem %s670_s0, %s508_s16 }
  0x11   : > { %v247_v1 = vld [vmem:[%s229_s20] sm:$0xf]  ;;  %s233_s26 = scalar_lea.vmem %s672_s2, %s498_s17  ;;  %s242_s29 = scalar_lea.vmem %s673_s3, %s508_s16 }
  0x12   : > { %522 = vmatpush3.bf16.xpose.msra.mxu0 %v247_v1  ;;  %v559_v2 = vld [vmem:[%s224_s23] sm:$0xff]  }
  0x13   : > { %v248_v21 = vld [vmem:[%s233_s26] sm:$0xf] }
  0x14   : > { %v327_v22 = vsel %vm325_vm2, %v248_v21, 0 }
  0x15   : > { %528 = vmatpush3.bf16.msra.mxu1 %v327_v22 }
  0x19   : > { %524 = vmatmul.mubr.bf16.vlgmr.msra.gmra.mrb[0].mxu0 %v559_v2 }
  0xec   : > { %v289_v3 = vpop.f32.mrb[0].mxu0 }
  0xed   : > { %v296_v4 = vmul.f32 0.088388346, %v289_v3  ;;  %v525_v5 = vpop.f32.mrb[1].mxu0 }
  0xee   : > { %v292_v6 = vpop.f32.mrb[2].mxu0 }
  0xef   : > { %v297_v7 = vmul.f32 0.088388346, %v292_v6  ;;  %v526_v8 = vpop.f32.mrb[3].mxu0  ;;  %v299_v9 = vsel %vm298_vm1, %v296_v4, -inf }
  0xf0   : > { %300 = vmax.xlane.f32.xlu0 %v299_v9 }
  0xf1   : > { %v302_v10 = vsel %vm298_vm1, %v297_v7, -inf }
  0xf4   : > { %303 = vmax.xlane.f32.xlu0 %v302_v10 }
 0x17d   : > { %v301_v11 = vpop.xlane.xlu0 %300 }
 0x17e   : > { %v305_v12 = vsub.f32 %v296_v4, %v301_v11 }
 0x180   : > { %v307_v13 = vmul.f32 1.442695, %v305_v12 }
 0x181   : > { %v304_v14 = vpop.xlane.xlu0 %303 }
 0x182   : > { %560 = vpow2.f32 %v307_v13  ;;  %v306_v15 = vsub.f32 %v297_v7, %v304_v14 }
 0x184   : > { %v309_v16 = vmul.f32 1.442695, %v306_v15 }
 0x186   : > { %562 = vpow2.f32 %v309_v16 }
 0x18c   : > { %v561_v17 = vpop.eup %560 }
 0x18d   : > { %v311_v18 = vsel %vm298_vm1, %v561_v17, 0.0 }
 0x18e   : > { %312 = vadd.xlane.f32.xlu1 %v311_v18 }
 0x190   : > { %v563_v19 = vpop.eup %562 }
 0x191   : > { %v314_v20 = vsel %vm298_vm1, %v563_v19, 0.0 }
 0x192   : > { %315 = vadd.xlane.f32.xlu1 %v314_v20 }
 0x21b   : > { %v313_v23 = vpop.xlane.xlu1 %312 }
 0x21c   : > { %564 = vrcp.f32 %v313_v23 }
 0x21f   : > { %v316_v24 = vpop.xlane.xlu1 %315 }
 0x220   : > { %566 = vrcp.f32 %v316_v24 }
 0x226   : > { %v565_v25 = vpop.eup %564 }
 0x227   : > { %v319_v27 = vmul.f32 %v565_v25, %v561_v17 }
 0x22a   : > { %v567_v26 = vpop.eup %566 }
 0x22b   : > { %v320_v28 = vmul.f32 %v567_v26, %v563_v19 }
 0x22d   : > { %v321_v29 = vpack.c.bf16 %v320_v28, %v319_v27 }
 0x22f   : > { %530 = vmatmul.mubr.msk.bf16.vlgmr.msra.gmra.mrb[0].mxu1 %vm298_vm1, %v321_v29 }
 0x302   : > { %v363_v30 = vpop.f32.mrb[0].mxu1 }
 0x303   : > { %v531_v31 = vpop.f32.mrb[1].mxu1 }
 0x304   : > { %v366_v32 = vpop.f32.mrb[2].mxu1 }
 0x305   : > { %v515_v33 = vpack.c.bf16 %v366_v32, %v363_v30  ;;  %v532_v34 = vpop.f32.mrb[3].mxu1 }
 0x307   : > { %516 = vst [vmem:[%s242_s29] sm:$0xff] %v515_v33  }
 0x308 PF: > { %s13_s14 = sadd.s32 1, %s590_s14   ;;  %s674_s12 = smov %s586_s13 }
 0x309   : > { %p10_p5 = scmp.ge.s32.totalorder %s13_s14, 6   ;;  %s675_s13 = smov %s677_s15 }
 0x30b   :  { %12 = sbr.rel (!%p10_p5) target bundleno = 2 (0x2), region = 68 }

// kernel: cross_attention_pallas.4
= control target key start
LH: loop header
LB: loop body
LE: loop exit
PB: predicated region body
PF: predicated region fallthrough
CT: control target
= control target key end

     0   :  { %9 = vsyncpa [#allocation3], 0  ;;  %s828_s0 = inlined_call_operand.hbm [shape: bf16[32,256], index: 0, kind: input, shape index: {}]   ;;  %s829_s1 = inlined_call_operand.hbm [shape: bf16[256,256], index: 1, kind: input, shape index: {}]   ;;  %s830_s2 = inlined_call_operand.hbm [shape: bf16[1,256], index: 2, kind: input, shape index: {}]   ;;  %s831_s3 = inlined_call_operand.hbm [shape: bf16[1,256], index: 3, kind: input, shape index: {}]   ;;  %s832_s4 = inlined_call_operand.vmem [shape: bf16[32,256], index: 4, kind: output, shape index: {}]  }
   0x1   :  { %10 = vsyncpa [#allocation5], 0 }
   0x2   :  { %11 = vsyncpa [#allocation8], 0  ;;  %s712_s15 = smov [#allocation4]   ;;  %s713_s17 = smov [#allocation2]  }
   0x3   :  { %s29_s16 = sshll.u32 %s712_s15, 4  ;;  %s17_s18 = sshll.u32 %s713_s17, 4  ;;  %s30_s16 = int_to_ptr.vmem [resolvable:$true] %s29_s16  ;;  %s744_s18 = int_to_ptr.vmem [resolvable:$true] %s17_s18 }
   0x4   :  { %s618_s21 = scalar_lea.hbm %s829_s1, 4096 }
   0x5   :  { %p619_p0 = scmp.ne.s32.totalorder %s829_s1, %s618_s21  ;;  %p622_p1 = scmp.lt.u32.totalorder %s618_s21, %s829_s1 }
   0x7   :  { %p624_p2 = pnand %p622_p1, %p619_p0 }
   0x9   :  { %627 = shalt.err (!%p624_p2)
}
   0xa   :  { %s628_s26 = scalar_lea.vmem %s30_s16, 4096  ;;  %p633_p4 = scmp.lt.s32.totalorder %s30_s16, %s30_s16 }
   0xb   :  { %p629_p3 = scmp.ne.s32.totalorder %s30_s16, %s628_s26  ;;  %p634_p5 = scmp.lt.s32.totalorder %s628_s26, %s628_s26 }
   0xd   :  { %p635_p6 = por %p634_p5, %p633_p4 }
   0xf   :  { %p636_p7 = pnand %p635_p6, %p629_p3 }
  0x11   :  { %639 = shalt.err (!%p636_p7)
}
  0x12   :  { %s714_s27 = smov 128   ;;  %s715_s28 = smov 8  }
  0x13   :  { %35 = dma.hbm_to_vmem [thread:$0]  %s829_s1, 4096, %s30_s16, [#allocation5], %s714_s27, %s714_s27, %s715_s28  }
  0x14   :  { %s640_s7 = scalar_lea.hbm %s828_s0, 512 }
  0x15   :  { %p641_p8 = scmp.ne.s32.totalorder %s828_s0, %s640_s7  ;;  %p644_p9 = scmp.lt.u32.totalorder %s640_s7, %s828_s0 }
  0x17   :  { %p646_p10 = pnand %p644_p9, %p641_p8 }
  0x19   :  { %649 = shalt.err (!%p646_p10)
}
  0x1a   :  { %s650_s12 = scalar_lea.vmem %s744_s18, 512  ;;  %p655_p12 = scmp.lt.s32.totalorder %s744_s18, %s744_s18 }
  0x1b   :  { %p651_p11 = scmp.ne.s32.totalorder %s744_s18, %s650_s12  ;;  %p656_p13 = scmp.lt.s32.totalorder %s650_s12, %s650_s12 }
  0x1d   :  { %p657_p0 = por %p656_p13, %p655_p12 }
  0x1f   :  { %p658_p1 = pnand %p657_p0, %p651_p11 }
  0x21   :  { %661 = shalt.err (!%p658_p1)
}
  0x22   :  { %23 = dma.hbm_to_vmem [thread:$0]  %s828_s0, 512, %s744_s18, [#allocation3], %s714_s27, %s714_s27, %s715_s28  }
  0x23   :  { %s716_s14 = smov [#allocation6]   ;;  %s717_s16 = smov [#allocation7]  }
  0x24   :  { %s42_s15 = sshll.u32 %s716_s14, 4  ;;  %s52_s17 = sshll.u32 %s717_s16, 4  ;;  %s43_s15 = int_to_ptr.vmem [resolvable:$true] %s42_s15  ;;  %s53_s17 = int_to_ptr.vmem [resolvable:$true] %s52_s17 }
  0x25   :  { %s662_s21 = scalar_lea.hbm %s830_s2, 32 }
  0x26   :  { %p663_p2 = scmp.ne.s32.totalorder %s830_s2, %s662_s21  ;;  %p666_p3 = scmp.lt.u32.totalorder %s662_s21, %s830_s2 }
  0x28   :  { %p668_p4 = pnand %p666_p3, %p663_p2 }
  0x2a   :  { %671 = shalt.err (!%p668_p4)
}
  0x2b   :  { %s672_s0 = scalar_lea.vmem %s43_s15, 32  ;;  %p677_p6 = scmp.lt.s32.totalorder %s43_s15, %s43_s15 }
  0x2c   :  { %p673_p5 = scmp.ne.s32.totalorder %s43_s15, %s672_s0  ;;  %p678_p7 = scmp.lt.s32.totalorder %s672_s0, %s672_s0 }
  0x2e   :  { %p679_p8 = por %p678_p7, %p677_p6 }
  0x30   :  { %p680_p9 = pnand %p679_p8, %p673_p5 }
  0x32   :  { %683 = shalt.err (!%p680_p9)
}
  0x33   :  { %45 = dma.hbm_to_vmem [thread:$0]  %s830_s2, 32, %s43_s15, [#allocation5]  }
  0x34   :  { %s684_s29 = scalar_lea.hbm %s831_s3, 32 }
  0x35   :  { %p685_p10 = scmp.ne.s32.totalorder %s831_s3, %s684_s29  ;;  %p688_p11 = scmp.lt.u32.totalorder %s684_s29, %s831_s3 }
  0x37   :  { %p690_p12 = pnand %p688_p11, %p685_p10 }
  0x39   :  { %693 = shalt.err (!%p690_p12)
}
  0x3a   :  { %s694_s8 = scalar_lea.vmem %s53_s17, 32  ;;  %p699_p0 = scmp.lt.s32.totalorder %s53_s17, %s53_s17 }
  0x3b   :  { %p695_p13 = scmp.ne.s32.totalorder %s53_s17, %s694_s8  ;;  %p700_p1 = scmp.lt.s32.totalorder %s694_s8, %s694_s8 }
  0x3d   :  { %p701_p2 = por %p700_p1, %p699_p0 }
  0x3f   :  { %p702_p3 = pnand %p701_p2, %p695_p13 }
  0x41   :  { %705 = shalt.err (!%p702_p3)
}
  0x42   :  { %55 = dma.hbm_to_vmem [thread:$0]  %s831_s3, 32, %s53_s17, [#allocation8]  }
  0x43   :  { %706 = dma.done.wait [#allocation3], 512  }
  0x44   :  { %707 = vsyncadd [#allocation3], 4294966784 }
  0x45   :  { %708 = dma.done.wait [#allocation5], 4128  }
  0x46   :  { %709 = vsyncadd [#allocation5], 4294963168 }
  0x47   :  { %710 = dma.done.wait [#allocation8], 32  }
  0x48   :  { %711 = vsyncadd [#allocation8], 4294967264  ;;  %v556_v0 = vld [vmem:[#allocation4 + $0x4] ss:$8 sps:$4 sm:$0xff]   ;;  %v558_v1 = vld [vmem:[#allocation4] ss:$8 sps:$4 sm:$0xff]   ;;  %v107_v36 = vlaneseq }
  0x49   :  { %305 = vmatprep.subr.bf16.mxu0 %v556_v0  ;;  %517 = vmatprep.subr.bf16.mxu1 %v556_v0  ;;  %v559_v2 = vld [vmem:[#allocation4 + $0x14] ss:$8 sps:$4 sm:$0xff]   ;;  %v561_v3 = vld [vmem:[#allocation4 + $0x10] ss:$8 sps:$4 sm:$0xff]   ;;  %v562_v4 = vld [vmem:[#allocation4 + $0x24] ss:$8 sps:$4 sm:$0xff]  }
  0x4a   :  { %306 = vmatpush1.bf16.msra.mxu0 %v558_v1  ;;  %533 = vmatpush1.bf16.msra.mxu1 %v558_v1  ;;  %v564_v5 = vld [vmem:[#allocation4 + $0x20] ss:$8 sps:$4 sm:$0xff]   ;;  %v565_v6 = vld [vmem:[#allocation4 + $0x34] ss:$8 sps:$4 sm:$0xff]   ;;  %v567_v7 = vld [vmem:[#allocation4 + $0x30] ss:$8 sps:$4 sm:$0xff]  }
  0x4b   :  { %307 = vmatprep.subr.bf16.mxu0 %v559_v2  ;;  %518 = vmatprep.subr.bf16.mxu1 %v559_v2  ;;  %v568_v8 = vld [vmem:[#allocation4 + $0x44] ss:$8 sps:$4 sm:$0xff]   ;;  %v570_v9 = vld [vmem:[#allocation4 + $0x40] ss:$8 sps:$4 sm:$0xff]   ;;  %v571_v10 = vld [vmem:[#allocation4 + $0x54] ss:$8 sps:$4 sm:$0xff]  }
  0x4c   :  { %v573_v11 = vld [vmem:[#allocation4 + $0x50] ss:$8 sps:$4 sm:$0xff]   ;;  %v574_v12 = vld [vmem:[#allocation4 + $0x64] ss:$8 sps:$4 sm:$0xff]   ;;  %v576_v14 = vld [vmem:[#allocation4 + $0x60] ss:$8 sps:$4 sm:$0xff]  }
  0x4d   :  { %v606_v13 = vld [vmem:[#allocation2 + $0x4] ss:$8 sps:$4 sm:$0xff]   ;;  %v609_v15 = vld [vmem:[#allocation2 + $0x14] ss:$8 sps:$4 sm:$0xff]   ;;  %v579_v17 = vld [vmem:[#allocation4 + $0x70] ss:$8 sps:$4 sm:$0xff]  }
  0x4e   :  { %308 = vmatpush1.bf16.msra.mxu0 %v561_v3  ;;  %534 = vmatpush1.bf16.msra.mxu1 %v561_v3  ;;  %v577_v16 = vld [vmem:[#allocation4 + $0x74] ss:$8 sps:$4 sm:$0xff]   ;;  %v580_v18 = vld [vmem:[#allocation4 + $0x84] ss:$8 sps:$4 sm:$0xff]   ;;  %v582_v19 = vld [vmem:[#allocation4 + $0x80] ss:$8 sps:$4 sm:$0xff]  }
  0x4f   :  { %309 = vmatprep.subr.bf16.mxu0 %v562_v4  ;;  %519 = vmatprep.subr.bf16.mxu1 %v562_v4  ;;  %v583_v20 = vld [vmem:[#allocation4 + $0x94] ss:$8 sps:$4 sm:$0xff]   ;;  %v585_v21 = vld [vmem:[#allocation4 + $0x90] ss:$8 sps:$4 sm:$0xff]   ;;  %v586_v22 = vld [vmem:[#allocation4 + $0xa4] ss:$8 sps:$4 sm:$0xff]  }
  0x50   :  { %337 = vmatprep.mubr.bf16.mxu0 %v606_v13  ;;  %347 = vmatprep.mubr.bf16.mxu1 %v609_v15  ;;  %v588_v23 = vld [vmem:[#allocation4 + $0xa0] ss:$8 sps:$4 sm:$0xff]   ;;  %v589_v24 = vld [vmem:[#allocation4 + $0xb4] ss:$8 sps:$4 sm:$0xff]   ;;  %v591_v25 = vld [vmem:[#allocation4 + $0xb0] ss:$8 sps:$4 sm:$0xff]  }
  0x51   :  { %v592_v26 = vld [vmem:[#allocation4 + $0xc4] ss:$8 sps:$4 sm:$0xff]   ;;  %v594_v27 = vld [vmem:[#allocation4 + $0xc0] ss:$8 sps:$4 sm:$0xff]   ;;  %v595_v28 = vld [vmem:[#allocation4 + $0xd4] ss:$8 sps:$4 sm:$0xff]  }
  0x52   :  { %310 = vmatpush1.bf16.msra.mxu0 %v564_v5  ;;  %535 = vmatpush1.bf16.msra.mxu1 %v564_v5  ;;  %v597_v29 = vld [vmem:[#allocation4 + $0xd0] ss:$8 sps:$4 sm:$0xff]   ;;  %v598_v30 = vld [vmem:[#allocation4 + $0xe4] ss:$8 sps:$4 sm:$0xff]   ;;  %v600_v31 = vld [vmem:[#allocation4 + $0xe0] ss:$8 sps:$4 sm:$0xff]  }
  0x53   :  { %311 = vmatprep.subr.bf16.mxu0 %v565_v6  ;;  %520 = vmatprep.subr.bf16.mxu1 %v565_v6  ;;  %v601_v32 = vld [vmem:[#allocation4 + $0xf4] ss:$8 sps:$4 sm:$0xff]   ;;  %v603_v33 = vld [vmem:[#allocation4 + $0xf0] ss:$8 sps:$4 sm:$0xff]   ;;  %v604_v34 = vld [vmem:[#allocation2] ss:$8 sps:$4 sm:$0xff]  }
  0x54   :  { %v607_v35 = vld [vmem:[#allocation2 + $0x10] ss:$8 sps:$4 sm:$0xff]   ;;  %v108_v37 = vshrl.u32 %v107_v36, 7  ;;  %v104_v38 = vld [vmem:[#allocation6] sm:$0x3] }
  0x55   :  { %v105_v39 = vunpack.c.l.bf16 %v104_v38 }
  0x56   :  { %312 = vmatpush1.bf16.msra.mxu0 %v567_v7  ;;  %536 = vmatpush1.bf16.msra.mxu1 %v567_v7  ;;  %v799_v40 = vsub.s32 0, %v108_v37  ;;  %v113_v41 = vsub.s32 2, %v108_v37 }
  0x57   :  { %313 = vmatprep.subr.bf16.mxu0 %v568_v8  ;;  %521 = vmatprep.subr.bf16.mxu1 %v568_v8 }
  0x58   :  { %v110_v42 = vrot.slane %v105_v39, %v799_v40  ;;  %v114_v43 = vrot.slane %v105_v39, %v113_v41 }
  0x5a   :  { %314 = vmatpush1.bf16.msra.mxu0 %v570_v9  ;;  %537 = vmatpush1.bf16.msra.mxu1 %v570_v9  ;;  %v120_v44 = vrot.slane %v110_v42, %v799_v40  ;;  %v124_v45 = vrot.slane %v114_v43, %v799_v40 }
  0x5b   :  { %315 = vmatprep.subr.bf16.mxu0 %v571_v10  ;;  %522 = vmatprep.subr.bf16.mxu1 %v571_v10  ;;  %v718_v10 = vmov 1966171168  }
  0x5e   :  { %316 = vmatpush1.bf16.msra.mxu0 %v573_v11  ;;  %538 = vmatpush1.bf16.msra.mxu1 %v573_v11  ;;  %v414_v11 = vunpack.c.l.s4 %v718_v10 }
  0x5f   :  { %317 = vmatprep.subr.bf16.mxu0 %v574_v12  ;;  %523 = vmatprep.subr.bf16.mxu1 %v574_v12 }
  0x62   :  { %318 = vmatpush1.bf16.msra.mxu0 %v576_v14  ;;  %539 = vmatpush1.bf16.msra.mxu1 %v576_v14 }
  0x63   :  { %319 = vmatprep.subr.bf16.mxu0 %v577_v16  ;;  %524 = vmatprep.subr.bf16.mxu1 %v577_v16 }
  0x66   :  { %320 = vmatpush1.bf16.msra.mxu0 %v579_v17  ;;  %540 = vmatpush1.bf16.msra.mxu1 %v579_v17  ;;  %v512_v17 = vld.sshfl [vmem:[#allocation7] sm:$0x11 pattern:$0x75316420] }
  0x67   :  { %321 = vmatprep.subr.bf16.mxu0 %v580_v18  ;;  %525 = vmatprep.subr.bf16.mxu1 %v580_v18  ;;  %v415_v18 = vunpack.c.0.s8 %v414_v11 }
  0x6a   :  { %322 = vmatpush1.bf16.msra.mxu0 %v582_v19  ;;  %541 = vmatpush1.bf16.msra.mxu1 %v582_v19 }
  0x6b   :  { %323 = vmatprep.subr.bf16.mxu0 %v583_v20  ;;  %526 = vmatprep.subr.bf16.mxu1 %v583_v20 }
  0x6e   :  { %324 = vmatpush1.bf16.msra.mxu0 %v585_v21  ;;  %542 = vmatpush1.bf16.msra.mxu1 %v585_v21 }
  0x6f   :  { %325 = vmatprep.subr.bf16.mxu0 %v586_v22  ;;  %527 = vmatprep.subr.bf16.mxu1 %v586_v22 }
  0x72   :  { %326 = vmatpush1.bf16.msra.mxu0 %v588_v23  ;;  %543 = vmatpush1.bf16.msra.mxu1 %v588_v23 }
  0x73   :  { %327 = vmatprep.subr.bf16.mxu0 %v589_v24  ;;  %528 = vmatprep.subr.bf16.mxu1 %v589_v24  ;;  %v412_v24 = vcombine.high %v512_v17, %v512_v17 }
  0x76   :  { %328 = vmatpush1.bf16.msra.mxu0 %v591_v25  ;;  %544 = vmatpush1.bf16.msra.mxu1 %v591_v25  ;;  %v418_v25 = vsub.s32 %v415_v18, %v108_v37 }
  0x77   :  { %329 = vmatprep.subr.bf16.mxu0 %v592_v26  ;;  %529 = vmatprep.subr.bf16.mxu1 %v592_v26 }
  0x7a   :  { %330 = vmatpush1.bf16.msra.mxu0 %v594_v27  ;;  %545 = vmatpush1.bf16.msra.mxu1 %v594_v27 }
  0x7b   :  { %331 = vmatprep.subr.bf16.mxu0 %v595_v28  ;;  %530 = vmatprep.subr.bf16.mxu1 %v595_v28  ;;  %v419_v28 = vrot.slane %v512_v17, %v418_v25 }
  0x7e   :  { %332 = vmatpush1.bf16.msra.mxu0 %v597_v29  ;;  %546 = vmatpush1.bf16.msra.mxu1 %v597_v29  ;;  %v426_v29 = vrot.slane %v412_v24, %v418_v25 }
  0x7f   :  { %333 = vmatprep.subr.bf16.mxu0 %v598_v30  ;;  %531 = vmatprep.subr.bf16.mxu1 %v598_v30  ;;  %v428_v30 = vpack.i.b16 %v419_v28, %v419_v28 }
  0x82   :  { %334 = vmatpush1.bf16.msra.mxu0 %v600_v31  ;;  %547 = vmatpush1.bf16.msra.mxu1 %v600_v31  ;;  %v435_v31 = vpack.i.b16 %v426_v29, %v426_v29 }
  0x83   :  { %335 = vmatprep.subr.bf16.mxu0 %v601_v32  ;;  %532 = vmatprep.subr.bf16.mxu1 %v601_v32 }
  0x84   :  { %v440_v36 = vrot.slane %v435_v31, %v799_v40 }
  0x86   :  { %336 = vmatpush1.bf16.msra.mxu0 %v603_v33  ;;  %548 = vmatpush1.bf16.msra.mxu1 %v603_v33 }
  0x89   :  { %338 = vmatmul.mubr.bf16.vlgmr.msra.gmra.mrb[0].mxu0 %v604_v34  ;;  %348 = vmatmul.mubr.bf16.vlgmr.msra.gmra.mrb[0].mxu1 %v607_v35  ;;  %v433_v35 = vrot.slane %v428_v30, %v799_v40 }
 0x15c   :  { %v339_v46 = vpop.f32.mrb[0].mxu0  ;;  %v349_v47 = vpop.f32.mrb[0].mxu1 }
 0x15d   :  { %v804_v48 = vadd.f32 %v339_v46, %v120_v44  ;;  %v350_v49 = vadd.f32 %v349_v47, %v120_v44  ;;  %v341_v50 = vpop.f32.mrb[1].mxu0  ;;  %v351_v51 = vpop.f32.mrb[1].mxu1 }
 0x15e   :  { %v806_v52 = vadd.f32 %v341_v50, %v124_v45  ;;  %v352_v53 = vadd.f32 %v351_v51, %v124_v45  ;;  %v343_v54 = vpop.f32.mrb[2].mxu0  ;;  %v353_v55 = vpop.f32.mrb[2].mxu1 }
 0x15f   :  { %v344_v56 = vadd.f32 %v343_v54, %v120_v44  ;;  %v354_v57 = vadd.f32 %v353_v55, %v120_v44  ;;  %v345_v58 = vpop.f32.mrb[3].mxu0  ;;  %v355_v59 = vpop.f32.mrb[3].mxu1  ;;  %v362_v60 = vmul.f32 %v350_v49, %v350_v49  ;;  %v358_v61 = vmul.f32 %v804_v48, %v804_v48 }
 0x160   :  { %v346_v62 = vadd.f32 %v345_v58, %v124_v45  ;;  %v356_v63 = vadd.f32 %v355_v59, %v124_v45  ;;  %v363_v0 = vmul.f32 %v352_v53, %v352_v53  ;;  %v359_v1 = vmul.f32 %v806_v52, %v806_v52 }
 0x161   :  { %v360_v2 = vmul.f32 %v344_v56, %v344_v56  ;;  %v364_v3 = vmul.f32 %v354_v57, %v354_v57 }
 0x162   :  { %v361_v4 = vmul.f32 %v346_v62, %v346_v62  ;;  %v365_v5 = vmul.f32 %v356_v63, %v356_v63  ;;  %v372_v6 = vadd.f32 %v363_v0, %v362_v60  ;;  %v366_v7 = vadd.f32 %v359_v1, %v358_v61 }
 0x164   :  { %373 = vadd.xlane.f32.xlu1 %v372_v6  ;;  %367 = vadd.xlane.f32.xlu0 %v366_v7  ;;  %v375_v8 = vadd.f32 %v365_v5, %v364_v3  ;;  %v369_v9 = vadd.f32 %v361_v4, %v360_v2 }
 0x168   :  { %376 = vadd.xlane.f32.xlu1 %v375_v8  ;;  %370 = vadd.xlane.f32.xlu0 %v369_v9 }
 0x1f1   :  { %v374_v12 = vpop.xlane.xlu1 %373  ;;  %v368_v13 = vpop.xlane.xlu0 %367 }
 0x1f2   :  { %v381_v14 = vmul.f32 0.00390625, %v374_v12  ;;  %v379_v15 = vmul.f32 0.00390625, %v368_v13 }
 0x1f4   :  { %v385_v16 = vadd.f32 1e-06, %v381_v14  ;;  %v383_v19 = vadd.f32 1e-06, %v379_v15 }
 0x1f5   :  { %v377_v20 = vpop.xlane.xlu1 %376  ;;  %v371_v21 = vpop.xlane.xlu0 %370 }
 0x1f6   :  { %v382_v22 = vmul.f32 0.00390625, %v377_v20  ;;  %v380_v23 = vmul.f32 0.00390625, %v371_v21  ;;  %610 = vrsqrt.f32 %v385_v16 }
 0x1f7   :  { %612 = vrsqrt.f32 %v383_v19 }
 0x1f8   :  { %v386_v26 = vadd.f32 1e-06, %v382_v22  ;;  %v384_v27 = vadd.f32 1e-06, %v380_v23 }
 0x1fa   :  { %614 = vrsqrt.f32 %v386_v26 }
 0x1fb   :  { %616 = vrsqrt.f32 %v384_v27 }
 0x200   :  { %v611_v32 = vpop.eup %610 }
 0x201   :  { %v613_v33 = vpop.eup %612  ;;  %v395_v39 = vmul.f32 %v611_v32, %v350_v49  ;;  %v396_v41 = vmul.f32 %v611_v32, %v352_v53 }
 0x202   :  { %v391_v43 = vmul.f32 %v613_v33, %v804_v48  ;;  %v392_v44 = vmul.f32 %v613_v33, %v806_v52 }
 0x204   :  { %v615_v34 = vpop.eup %614 }
 0x205   :  { %v617_v38 = vpop.eup %616  ;;  %v397_v37 = vmul.f32 %v615_v34, %v354_v57  ;;  %v398_v42 = vmul.f32 %v615_v34, %v356_v63 }
 0x206   :  { %v393_v45 = vmul.f32 %v617_v38, %v344_v56  ;;  %v394_v46 = vmul.f32 %v617_v38, %v346_v62 }
 0x207   :  { %v401_v47 = vpack.c.bf16 %v397_v37, %v395_v39  ;;  %v402_v50 = vpack.c.bf16 %v398_v42, %v396_v41 }
 0x208   :  { %v399_v51 = vpack.c.bf16 %v393_v45, %v391_v43  ;;  %v400_v54 = vpack.c.bf16 %v394_v46, %v392_v44 }
 0x209   :  { %v443_v55 = vmul.bf16 %v433_v35, %v401_v47  ;;  %v444_v58 = vmul.bf16 %v440_v36, %v402_v50 }
 0x20a   :  { %v441_v59 = vmul.bf16 %v433_v35, %v399_v51  ;;  %v442_v60 = vmul.bf16 %v440_v36, %v400_v54 }
 0x20b   :  { %v515_v40 = vcombine.low %v443_v55, %v444_v58  ;;  %v516_v61 = vcombine.high %v443_v55, %v444_v58 }
 0x20c   :  { %v513_v49 = vcombine.low %v441_v59, %v442_v60  ;;  %v514_v53 = vcombine.high %v441_v59, %v442_v60 }
 0x20d   :  { %467 = vst [vmem:[%s832_s4 + $0x10] sm:$0xff] %v515_v40  ;;  %468 = vst [vmem:[%s832_s4 + $0x18] sm:$0xff] %v516_v61 }
 0x20e   :  { %465 = vst [vmem:[%s832_s4] sm:$0xff] %v513_v49  ;;  %466 = vst [vmem:[%s832_s4 + $0x8] sm:$0xff] %v514_v53 }
 0x20f   :  { %473 = vsyncpa [#allocation3], 1 }
 0x210   :  { %474 = vsyncpa [#allocation5], 1 }
 0x211   :  { %475 = vsyncpa [#allocation8], 1 }

// kernel: cross_attention_pallas.7
= control target key start
LH: loop header
LB: loop body
LE: loop exit
PB: predicated region body
PF: predicated region fallthrough
CT: control target
= control target key end

     0   :  { %s652_s0 = inlined_call_operand.vmem [shape: bf16[32,256], index: 0, kind: input, shape index: {}]   ;;  %s653_s1 = inlined_call_operand.vmem [shape: bf16[256,256], index: 1, kind: input, shape index: {}]   ;;  %s654_s2 = inlined_call_operand.vmem [shape: bf16[1,256], index: 2, kind: input, shape index: {}]   ;;  %s655_s3 = inlined_call_operand.hbm [shape: bf16[32,256], index: 3, kind: output, shape index: {}]  }
   0x1   :  { %v428_v0 = vld [vmem:[%s653_s1 + $0x4] ss:$8 sps:$4 sm:$0xff]   ;;  %v430_v1 = vld [vmem:[%s653_s1] ss:$8 sps:$4 sm:$0xff]   ;;  %v431_v2 = vld [vmem:[%s653_s1 + $0x14] ss:$8 sps:$4 sm:$0xff]  }
   0x2   :  { %252 = vmatprep.subr.bf16.mxu0 %v428_v0  ;;  %393 = vmatprep.subr.bf16.mxu1 %v428_v0  ;;  %v433_v3 = vld [vmem:[%s653_s1 + $0x10] ss:$8 sps:$4 sm:$0xff]   ;;  %v434_v4 = vld [vmem:[%s653_s1 + $0x24] ss:$8 sps:$4 sm:$0xff]   ;;  %v436_v5 = vld [vmem:[%s653_s1 + $0x20] ss:$8 sps:$4 sm:$0xff]  }
   0x3   :  { %253 = vmatpush1.bf16.msra.mxu0 %v430_v1  ;;  %409 = vmatpush1.bf16.msra.mxu1 %v430_v1  ;;  %v437_v6 = vld [vmem:[%s653_s1 + $0x34] ss:$8 sps:$4 sm:$0xff]   ;;  %v439_v7 = vld [vmem:[%s653_s1 + $0x30] ss:$8 sps:$4 sm:$0xff]   ;;  %v440_v8 = vld [vmem:[%s653_s1 + $0x44] ss:$8 sps:$4 sm:$0xff]  }
   0x4   :  { %254 = vmatprep.subr.bf16.mxu0 %v431_v2  ;;  %394 = vmatprep.subr.bf16.mxu1 %v431_v2  ;;  %v442_v9 = vld [vmem:[%s653_s1 + $0x40] ss:$8 sps:$4 sm:$0xff]   ;;  %v443_v10 = vld [vmem:[%s653_s1 + $0x54] ss:$8 sps:$4 sm:$0xff]   ;;  %v445_v11 = vld [vmem:[%s653_s1 + $0x50] ss:$8 sps:$4 sm:$0xff]  }
   0x5   :  { %v446_v12 = vld [vmem:[%s653_s1 + $0x64] ss:$8 sps:$4 sm:$0xff]   ;;  %v448_v14 = vld [vmem:[%s653_s1 + $0x60] ss:$8 sps:$4 sm:$0xff]   ;;  %v481_v15 = vld [vmem:[%s652_s0 + $0x14] ss:$8 sps:$4 sm:$0xff]  }
   0x6   :  { %v478_v13 = vld [vmem:[%s652_s0 + $0x4] ss:$8 sps:$4 sm:$0xff]   ;;  %v449_v16 = vld [vmem:[%s653_s1 + $0x74] ss:$8 sps:$4 sm:$0xff]  }
   0x7   :  { %255 = vmatpush1.bf16.msra.mxu0 %v433_v3  ;;  %410 = vmatpush1.bf16.msra.mxu1 %v433_v3 }
   0x8   :  { %256 = vmatprep.subr.bf16.mxu0 %v434_v4  ;;  %395 = vmatprep.subr.bf16.mxu1 %v434_v4 }
   0xb   :  { %257 = vmatpush1.bf16.msra.mxu0 %v436_v5  ;;  %411 = vmatpush1.bf16.msra.mxu1 %v436_v5 }
   0xc   :  { %258 = vmatprep.subr.bf16.mxu0 %v437_v6  ;;  %396 = vmatprep.subr.bf16.mxu1 %v437_v6 }
   0xf   :  { %259 = vmatpush1.bf16.msra.mxu0 %v439_v7  ;;  %412 = vmatpush1.bf16.msra.mxu1 %v439_v7 }
  0x10   :  { %260 = vmatprep.subr.bf16.mxu0 %v440_v8  ;;  %397 = vmatprep.subr.bf16.mxu1 %v440_v8 }
  0x13   :  { %261 = vmatpush1.bf16.msra.mxu0 %v442_v9  ;;  %413 = vmatpush1.bf16.msra.mxu1 %v442_v9 }
  0x14   :  { %262 = vmatprep.subr.bf16.mxu0 %v443_v10  ;;  %398 = vmatprep.subr.bf16.mxu1 %v443_v10 }
  0x17   :  { %263 = vmatpush1.bf16.msra.mxu0 %v445_v11  ;;  %414 = vmatpush1.bf16.msra.mxu1 %v445_v11 }
  0x18   :  { %264 = vmatprep.subr.bf16.mxu0 %v446_v12  ;;  %399 = vmatprep.subr.bf16.mxu1 %v446_v12 }
  0x19   :  { %8 = vsyncpa [#allocation3], 0  ;;  %284 = vmatprep.mubr.bf16.mxu0 %v478_v13  ;;  %294 = vmatprep.mubr.bf16.mxu1 %v481_v15  ;;  %v451_v17 = vld [vmem:[%s653_s1 + $0x70] ss:$8 sps:$4 sm:$0xff]   ;;  %v452_v18 = vld [vmem:[%s653_s1 + $0x84] ss:$8 sps:$4 sm:$0xff]   ;;  %v54_v36 = vlaneseq }
  0x1a   :  { %v454_v19 = vld [vmem:[%s653_s1 + $0x80] ss:$8 sps:$4 sm:$0xff]   ;;  %v455_v20 = vld [vmem:[%s653_s1 + $0x94] ss:$8 sps:$4 sm:$0xff]   ;;  %v457_v21 = vld [vmem:[%s653_s1 + $0x90] ss:$8 sps:$4 sm:$0xff]  }
  0x1b   :  { %265 = vmatpush1.bf16.msra.mxu0 %v448_v14  ;;  %415 = vmatpush1.bf16.msra.mxu1 %v448_v14  ;;  %v458_v22 = vld [vmem:[%s653_s1 + $0xa4] ss:$8 sps:$4 sm:$0xff]   ;;  %v460_v23 = vld [vmem:[%s653_s1 + $0xa0] ss:$8 sps:$4 sm:$0xff]   ;;  %v461_v24 = vld [vmem:[%s653_s1 + $0xb4] ss:$8 sps:$4 sm:$0xff]  }
  0x1c   :  { %266 = vmatprep.subr.bf16.mxu0 %v449_v16  ;;  %400 = vmatprep.subr.bf16.mxu1 %v449_v16  ;;  %v463_v25 = vld [vmem:[%s653_s1 + $0xb0] ss:$8 sps:$4 sm:$0xff]   ;;  %v464_v26 = vld [vmem:[%s653_s1 + $0xc4] ss:$8 sps:$4 sm:$0xff]   ;;  %v466_v27 = vld [vmem:[%s653_s1 + $0xc0] ss:$8 sps:$4 sm:$0xff]  }
  0x1d   :  { %v467_v28 = vld [vmem:[%s653_s1 + $0xd4] ss:$8 sps:$4 sm:$0xff]   ;;  %v469_v29 = vld [vmem:[%s653_s1 + $0xd0] ss:$8 sps:$4 sm:$0xff]   ;;  %v470_v30 = vld [vmem:[%s653_s1 + $0xe4] ss:$8 sps:$4 sm:$0xff]  }
  0x1e   :  { %v472_v31 = vld [vmem:[%s653_s1 + $0xe0] ss:$8 sps:$4 sm:$0xff]   ;;  %v473_v32 = vld [vmem:[%s653_s1 + $0xf4] ss:$8 sps:$4 sm:$0xff]   ;;  %v475_v33 = vld [vmem:[%s653_s1 + $0xf0] ss:$8 sps:$4 sm:$0xff]  }
  0x1f   :  { %267 = vmatpush1.bf16.msra.mxu0 %v451_v17  ;;  %416 = vmatpush1.bf16.msra.mxu1 %v451_v17  ;;  %v476_v34 = vld [vmem:[%s652_s0] ss:$8 sps:$4 sm:$0xff]   ;;  %v479_v35 = vld [vmem:[%s652_s0 + $0x10] ss:$8 sps:$4 sm:$0xff]   ;;  %v55_v37 = vshrl.u32 %v54_v36, 7  ;;  %s506_s0 = smov [#allocation2]  }
  0x20   :  { %268 = vmatprep.subr.bf16.mxu0 %v452_v18  ;;  %401 = vmatprep.subr.bf16.mxu1 %v452_v18  ;;  %v51_v38 = vld [vmem:[%s654_s2] sm:$0x3]  ;;  %s338_s1 = sshll.u32 %s506_s0, 4  ;;  %s339_s1 = int_to_ptr.vmem [resolvable:$true] %s338_s1 }
  0x21   :  { %v52_v39 = vunpack.c.l.bf16 %v51_v38  ;;  %v56_v40 = vsub.s32 0, %v55_v37  ;;  %v60_v41 = vsub.s32 2, %v55_v37  ;;  %s482_s2 = scalar_lea.vmem %s339_s1, 512  ;;  %p487_p1 = scmp.lt.s32.totalorder %s339_s1, %s339_s1 }
  0x22   :  { %p483_p0 = scmp.ne.s32.totalorder %s339_s1, %s482_s2  ;;  %p488_p2 = scmp.lt.s32.totalorder %s482_s2, %s482_s2 }
  0x23   :  { %269 = vmatpush1.bf16.msra.mxu0 %v454_v19  ;;  %417 = vmatpush1.bf16.msra.mxu1 %v454_v19  ;;  %v57_v42 = vrot.slane %v52_v39, %v56_v40  ;;  %v61_v43 = vrot.slane %v52_v39, %v60_v41 }
  0x24   :  { %270 = vmatprep.subr.bf16.mxu0 %v455_v20  ;;  %402 = vmatprep.subr.bf16.mxu1 %v455_v20  ;;  %p489_p3 = por %p488_p2, %p487_p1 }
  0x25   :  { %v67_v44 = vrot.slane %v57_v42, %v56_v40  ;;  %v71_v45 = vrot.slane %v61_v43, %v56_v40 }
  0x26   :  { %p490_p4 = pnand %p489_p3, %p483_p0 }
  0x27   :  { %271 = vmatpush1.bf16.msra.mxu0 %v457_v21  ;;  %418 = vmatpush1.bf16.msra.mxu1 %v457_v21 }
  0x28   :  { %272 = vmatprep.subr.bf16.mxu0 %v458_v22  ;;  %403 = vmatprep.subr.bf16.mxu1 %v458_v22 }
  0x2b   :  { %273 = vmatpush1.bf16.msra.mxu0 %v460_v23  ;;  %419 = vmatpush1.bf16.msra.mxu1 %v460_v23 }
  0x2c   :  { %274 = vmatprep.subr.bf16.mxu0 %v461_v24  ;;  %404 = vmatprep.subr.bf16.mxu1 %v461_v24 }
  0x2f   :  { %275 = vmatpush1.bf16.msra.mxu0 %v463_v25  ;;  %420 = vmatpush1.bf16.msra.mxu1 %v463_v25 }
  0x30   :  { %276 = vmatprep.subr.bf16.mxu0 %v464_v26  ;;  %405 = vmatprep.subr.bf16.mxu1 %v464_v26 }
  0x33   :  { %277 = vmatpush1.bf16.msra.mxu0 %v466_v27  ;;  %421 = vmatpush1.bf16.msra.mxu1 %v466_v27 }
  0x34   :  { %278 = vmatprep.subr.bf16.mxu0 %v467_v28  ;;  %406 = vmatprep.subr.bf16.mxu1 %v467_v28 }
  0x37   :  { %279 = vmatpush1.bf16.msra.mxu0 %v469_v29  ;;  %422 = vmatpush1.bf16.msra.mxu1 %v469_v29 }
  0x38   :  { %280 = vmatprep.subr.bf16.mxu0 %v470_v30  ;;  %407 = vmatprep.subr.bf16.mxu1 %v470_v30 }
  0x3b   :  { %281 = vmatpush1.bf16.msra.mxu0 %v472_v31  ;;  %423 = vmatpush1.bf16.msra.mxu1 %v472_v31 }
  0x3c   :  { %282 = vmatprep.subr.bf16.mxu0 %v473_v32  ;;  %408 = vmatprep.subr.bf16.mxu1 %v473_v32 }
  0x3f   :  { %283 = vmatpush1.bf16.msra.mxu0 %v475_v33  ;;  %424 = vmatpush1.bf16.msra.mxu1 %v475_v33 }
  0x42   :  { %285 = vmatmul.mubr.bf16.vlgmr.msra.gmra.mrb[0].mxu0 %v476_v34  ;;  %295 = vmatmul.mubr.bf16.vlgmr.msra.gmra.mrb[0].mxu1 %v479_v35 }
 0x115   :  { %v286_v46 = vpop.f32.mrb[0].mxu0  ;;  %v296_v47 = vpop.f32.mrb[0].mxu1 }
 0x116   :  { %v287_v48 = vadd.f32 %v286_v46, %v67_v44  ;;  %v297_v49 = vadd.f32 %v296_v47, %v67_v44  ;;  %v288_v50 = vpop.f32.mrb[1].mxu0  ;;  %v298_v51 = vpop.f32.mrb[1].mxu1 }
 0x117   :  { %v289_v52 = vadd.f32 %v288_v50, %v71_v45  ;;  %v299_v53 = vadd.f32 %v298_v51, %v71_v45  ;;  %v290_v54 = vpop.f32.mrb[2].mxu0  ;;  %v300_v55 = vpop.f32.mrb[2].mxu1 }
 0x118   :  { %v291_v56 = vadd.f32 %v290_v54, %v67_v44  ;;  %v301_v57 = vadd.f32 %v300_v55, %v67_v44  ;;  %v292_v58 = vpop.f32.mrb[3].mxu0  ;;  %v302_v59 = vpop.f32.mrb[3].mxu1 }
 0x119   :  { %v389_v60 = vpack.c.bf16 %v289_v52, %v287_v48  ;;  %v391_v61 = vpack.c.bf16 %v299_v53, %v297_v49  ;;  %v293_v62 = vadd.f32 %v292_v58, %v71_v45  ;;  %v303_v63 = vadd.f32 %v302_v59, %v71_v45 }
 0x11b   :  { %329 = vst [vmem:[#allocation2] sm:$0xff] %v389_v60  ;;  %331 = vst [vmem:[#allocation2 + $0x10] sm:$0xff] %v391_v61  ;;  %v390_v0 = vpack.c.bf16 %v293_v62, %v291_v56  ;;  %v392_v1 = vpack.c.bf16 %v303_v63, %v301_v57 }
 0x11d   :  { %330 = vst [vmem:[#allocation2 + $0x8] sm:$0xff] %v390_v0  ;;  %332 = vst [vmem:[#allocation2 + $0x18] sm:$0xff] %v392_v1 }
 0x11e   :  { %493 = shalt.err (!%p490_p4)
}
 0x11f   :  { %s494_s7 = scalar_lea.hbm %s655_s3, 512 }
 0x120   :  { %p495_p5 = scmp.ne.s32.totalorder %s655_s3, %s494_s7  ;;  %p498_p6 = scmp.lt.u32.totalorder %s494_s7, %s655_s3 }
 0x122   :  { %p500_p7 = pnand %p498_p6, %p495_p5 }
 0x124   :  { %503 = shalt.err (!%p500_p7)
}
 0x125   :  { %s507_s12 = smov 128   ;;  %s508_s13 = smov 8  }
 0x126   :  { %344 = dma.vmem_to_hbm [thread:$0]  %s339_s1, 512, %s655_s3, [#allocation3], %s507_s12, %s507_s12, %s508_s13  }
 0x127   :  { %504 = dma.done.wait [#allocation3], 512  }
 0x128   :  { %505 = vsyncadd [#allocation3], 4294966784 }
 0x129   :  { %348 = vsyncpa [#allocation3], 1 }

// kernel: cross_attention_pallas.5
= control target key start
LH: loop header
LB: loop body
LE: loop exit
PB: predicated region body
PF: predicated region fallthrough
CT: control target
= control target key end

     0   :  { %13 = vsyncpa [#allocation3], 0  ;;  %s865_s24 = smov [#allocation2]   ;;  %s1044_s0 = inlined_call_operand.vmem [shape: bf16[16,256], index: 0, kind: input, shape index: {}]   ;;  %s1045_s1 = inlined_call_operand.vmem [shape: bf16[256,256], index: 1, kind: input, shape index: {}]   ;;  %s1046_s2 = inlined_call_operand.vmem [shape: bf16[1,256], index: 2, kind: input, shape index: {}]   ;;  %s1047_s3 = inlined_call_operand.vmem [shape: bf16[1,256], index: 3, kind: input, shape index: {}]   ;;  %s1048_s4 = inlined_call_operand.hbm [shape: bf16[256,256], index: 4, kind: input, shape index: {}]   ;;  %s1049_s5 = inlined_call_operand.vmem [shape: bf16[1,256], index: 5, kind: input, shape index: {}]   ;;  %s1050_s6 = inlined_call_operand.vmem [shape: bf16[16,256], index: 6, kind: output, shape index: {0}]   ;;  %s1051_s7 = inlined_call_operand.vmem [shape: bf16[16,256], index: 7, kind: output, shape index: {1}]  }
   0x1   :  { %s27_s25 = sshll.u32 %s865_s24, 4  ;;  %s841_s28 = scalar_lea.hbm %s1048_s4, 4096  ;;  %s28_s25 = int_to_ptr.vmem [resolvable:$true] %s27_s25 }
   0x2   :  { %p842_p0 = scmp.ne.s32.totalorder %s1048_s4, %s841_s28  ;;  %p845_p1 = scmp.lt.u32.totalorder %s841_s28, %s1048_s4 }
   0x4   :  { %p847_p2 = pnand %p845_p1, %p842_p0 }
   0x6   :  { %850 = shalt.err (!%p847_p2)
}
   0x7   :  { %s851_s10 = scalar_lea.vmem %s28_s25, 4096  ;;  %p856_p4 = scmp.lt.s32.totalorder %s28_s25, %s28_s25 }
   0x8   :  { %p852_p3 = scmp.ne.s32.totalorder %s28_s25, %s851_s10  ;;  %p857_p5 = scmp.lt.s32.totalorder %s851_s10, %s851_s10 }
   0xa   :  { %p858_p6 = por %p857_p5, %p856_p4 }
   0xc   :  { %p859_p7 = pnand %p858_p6, %p852_p3 }
   0xe   :  { %862 = shalt.err (!%p859_p7)
}
   0xf   :  { %s866_s11 = smov 128   ;;  %s867_s12 = smov 8  }
  0x10   :  { %33 = dma.hbm_to_vmem [thread:$0]  %s1048_s4, 4096, %s28_s25, [#allocation3], %s866_s11, %s866_s11, %s867_s12  }
  0x11   :  { %863 = dma.done.wait [#allocation3], 4096  }
  0x12   :  { %864 = vsyncadd [#allocation3], 4294963200  ;;  %v738_v0 = vld [vmem:[%s1045_s1 + $0x4] ss:$8 sps:$4 sm:$0xff]   ;;  %v740_v1 = vld [vmem:[%s1045_s1] ss:$8 sps:$4 sm:$0xff]  }
  0x13   :  { %264 = vmatprep.subr.bf16.mxu0 %v738_v0  ;;  %v741_v2 = vld [vmem:[%s1045_s1 + $0x14] ss:$8 sps:$4 sm:$0xff]   ;;  %v743_v3 = vld [vmem:[%s1045_s1 + $0x10] ss:$8 sps:$4 sm:$0xff]   ;;  %v744_v4 = vld [vmem:[%s1045_s1 + $0x24] ss:$8 sps:$4 sm:$0xff]  }
  0x14   :  { %265 = vmatpush1.bf16.msra.mxu0 %v740_v1  ;;  %v746_v5 = vld [vmem:[%s1045_s1 + $0x20] ss:$8 sps:$4 sm:$0xff]   ;;  %v747_v6 = vld [vmem:[%s1045_s1 + $0x34] ss:$8 sps:$4 sm:$0xff]   ;;  %v749_v7 = vld [vmem:[%s1045_s1 + $0x30] ss:$8 sps:$4 sm:$0xff]  }
  0x15   :  { %266 = vmatprep.subr.bf16.mxu0 %v741_v2  ;;  %v750_v8 = vld [vmem:[%s1045_s1 + $0x44] ss:$8 sps:$4 sm:$0xff]   ;;  %v752_v9 = vld [vmem:[%s1045_s1 + $0x40] ss:$8 sps:$4 sm:$0xff]   ;;  %v753_v10 = vld [vmem:[%s1045_s1 + $0x54] ss:$8 sps:$4 sm:$0xff]   ;;  %v76_v2 = vlaneseq }
  0x16   :  { %v755_v11 = vld [vmem:[%s1045_s1 + $0x50] ss:$8 sps:$4 sm:$0xff]   ;;  %v756_v12 = vld [vmem:[%s1045_s1 + $0x64] ss:$8 sps:$4 sm:$0xff]   ;;  %v758_v13 = vld [vmem:[%s1045_s1 + $0x60] ss:$8 sps:$4 sm:$0xff]  }
  0x17   :  { %v759_v14 = vld [vmem:[%s1045_s1 + $0x74] ss:$8 sps:$4 sm:$0xff]   ;;  %v788_v15 = vld [vmem:[%s1044_s0 + $0x4] ss:$8 sps:$4 sm:$0xff]   ;;  %v791_v17 = vld [vmem:[#allocation2] ss:$8 sps:$4 sm:$0xff]  }
  0x18   :  { %267 = vmatpush1.bf16.msra.mxu0 %v743_v3  ;;  %v789_v16 = vld [vmem:[#allocation2 + $0x4] ss:$8 sps:$4 sm:$0xff]   ;;  %296 = vmatprep.mubr.bf16.mxu0 %v788_v15  ;;  %v792_v18 = vld [vmem:[#allocation2 + $0x14] ss:$8 sps:$4 sm:$0xff]   ;;  %v794_v19 = vld [vmem:[#allocation2 + $0x10] ss:$8 sps:$4 sm:$0xff]  }
  0x19   :  { %268 = vmatprep.subr.bf16.mxu0 %v744_v4  ;;  %595 = vmatprep.subr.bf16.mxu1 %v789_v16  ;;  %v761_v20 = vld [vmem:[%s1045_s1 + $0x70] ss:$8 sps:$4 sm:$0xff]   ;;  %v795_v21 = vld [vmem:[#allocation2 + $0x24] ss:$8 sps:$4 sm:$0xff]   ;;  %v797_v23 = vld [vmem:[#allocation2 + $0x20] ss:$8 sps:$4 sm:$0xff]  }
  0x1a   :  { %627 = vmatprep.mubr.bf16.mxu1 %v788_v15  ;;  %596 = vmatpush1.bf16.msra.mxu1 %v791_v17  ;;  %v762_v22 = vld [vmem:[%s1045_s1 + $0x84] ss:$8 sps:$4 sm:$0xff]   ;;  %v764_v24 = vld [vmem:[%s1045_s1 + $0x80] ss:$8 sps:$4 sm:$0xff]   ;;  %v798_v25 = vld [vmem:[#allocation2 + $0x34] ss:$8 sps:$4 sm:$0xff]  }
  0x1b   :  { %597 = vmatprep.subr.bf16.mxu1 %v792_v18  ;;  %v765_v26 = vld [vmem:[%s1045_s1 + $0x94] ss:$8 sps:$4 sm:$0xff]   ;;  %v800_v27 = vld [vmem:[#allocation2 + $0x30] ss:$8 sps:$4 sm:$0xff]   ;;  %v801_v29 = vld [vmem:[#allocation2 + $0x44] ss:$8 sps:$4 sm:$0xff]  }
  0x1c   :  { %269 = vmatpush1.bf16.msra.mxu0 %v746_v5  ;;  %v767_v28 = vld [vmem:[%s1045_s1 + $0x90] ss:$8 sps:$4 sm:$0xff]   ;;  %v768_v30 = vld [vmem:[%s1045_s1 + $0xa4] ss:$8 sps:$4 sm:$0xff]   ;;  %v803_v31 = vld [vmem:[#allocation2 + $0x40] ss:$8 sps:$4 sm:$0xff]  }
  0x1d   :  { %270 = vmatprep.subr.bf16.mxu0 %v747_v6  ;;  %v770_v32 = vld [vmem:[%s1045_s1 + $0xa0] ss:$8 sps:$4 sm:$0xff]   ;;  %v804_v33 = vld [vmem:[#allocation2 + $0x54] ss:$8 sps:$4 sm:$0xff]   ;;  %v806_v35 = vld [vmem:[#allocation2 + $0x50] ss:$8 sps:$4 sm:$0xff]  }
  0x1e   :  { %598 = vmatpush1.bf16.msra.mxu1 %v794_v19  ;;  %v771_v34 = vld [vmem:[%s1045_s1 + $0xb4] ss:$8 sps:$4 sm:$0xff]   ;;  %v773_v36 = vld [vmem:[%s1045_s1 + $0xb0] ss:$8 sps:$4 sm:$0xff]   ;;  %v807_v37 = vld [vmem:[#allocation2 + $0x64] ss:$8 sps:$4 sm:$0xff]  }
  0x1f   :  { %599 = vmatprep.subr.bf16.mxu1 %v795_v21  ;;  %v774_v38 = vld [vmem:[%s1045_s1 + $0xc4] ss:$8 sps:$4 sm:$0xff]   ;;  %v809_v39 = vld [vmem:[#allocation2 + $0x60] ss:$8 sps:$4 sm:$0xff]   ;;  %v810_v41 = vld [vmem:[#allocation2 + $0x74] ss:$8 sps:$4 sm:$0xff]  }
  0x20   :  { %271 = vmatpush1.bf16.msra.mxu0 %v749_v7  ;;  %v776_v40 = vld [vmem:[%s1045_s1 + $0xc0] ss:$8 sps:$4 sm:$0xff]   ;;  %v777_v42 = vld [vmem:[%s1045_s1 + $0xd4] ss:$8 sps:$4 sm:$0xff]   ;;  %v812_v43 = vld [vmem:[#allocation2 + $0x70] ss:$8 sps:$4 sm:$0xff]  }
  0x21   :  { %272 = vmatprep.subr.bf16.mxu0 %v750_v8  ;;  %v779_v44 = vld [vmem:[%s1045_s1 + $0xd0] ss:$8 sps:$4 sm:$0xff]   ;;  %v813_v45 = vld [vmem:[#allocation2 + $0x84] ss:$8 sps:$4 sm:$0xff]   ;;  %v815_v47 = vld [vmem:[#allocation2 + $0x80] ss:$8 sps:$4 sm:$0xff]  }
  0x22   :  { %600 = vmatpush1.bf16.msra.mxu1 %v797_v23  ;;  %v780_v46 = vld [vmem:[%s1045_s1 + $0xe4] ss:$8 sps:$4 sm:$0xff]   ;;  %v782_v48 = vld [vmem:[%s1045_s1 + $0xe0] ss:$8 sps:$4 sm:$0xff]   ;;  %v816_v49 = vld [vmem:[#allocation2 + $0x94] ss:$8 sps:$4 sm:$0xff]  }
  0x23   :  { %601 = vmatprep.subr.bf16.mxu1 %v798_v25  ;;  %v783_v50 = vld [vmem:[%s1045_s1 + $0xf4] ss:$8 sps:$4 sm:$0xff]   ;;  %v818_v51 = vld [vmem:[#allocation2 + $0x90] ss:$8 sps:$4 sm:$0xff]   ;;  %v819_v53 = vld [vmem:[#allocation2 + $0xa4] ss:$8 sps:$4 sm:$0xff]  }
  0x24   :  { %273 = vmatpush1.bf16.msra.mxu0 %v752_v9  ;;  %v785_v52 = vld [vmem:[%s1045_s1 + $0xf0] ss:$8 sps:$4 sm:$0xff]   ;;  %v786_v54 = vld [vmem:[%s1044_s0] ss:$8 sps:$4 sm:$0xff]   ;;  %v822_v56 = vld [vmem:[#allocation2 + $0xb4] ss:$8 sps:$4 sm:$0xff]  }
  0x25   :  { %274 = vmatprep.subr.bf16.mxu0 %v753_v10  ;;  %v821_v55 = vld [vmem:[#allocation2 + $0xa0] ss:$8 sps:$4 sm:$0xff]   ;;  %v824_v57 = vld [vmem:[#allocation2 + $0xb0] ss:$8 sps:$4 sm:$0xff]   ;;  %v825_v58 = vld [vmem:[#allocation2 + $0xc4] ss:$8 sps:$4 sm:$0xff]  }
  0x26   :  { %602 = vmatpush1.bf16.msra.mxu1 %v800_v27  ;;  %v827_v59 = vld [vmem:[#allocation2 + $0xc0] ss:$8 sps:$4 sm:$0xff]   ;;  %v828_v60 = vld [vmem:[#allocation2 + $0xd4] ss:$8 sps:$4 sm:$0xff]   ;;  %v830_v61 = vld [vmem:[#allocation2 + $0xd0] ss:$8 sps:$4 sm:$0xff]  }
  0x27   :  { %603 = vmatprep.subr.bf16.mxu1 %v801_v29  ;;  %v831_v62 = vld [vmem:[#allocation2 + $0xe4] ss:$8 sps:$4 sm:$0xff]   ;;  %v833_v63 = vld [vmem:[#allocation2 + $0xe0] ss:$8 sps:$4 sm:$0xff]   ;;  %v834_v0 = vld [vmem:[#allocation2 + $0xf4] ss:$8 sps:$4 sm:$0xff]  }
  0x28   :  { %275 = vmatpush1.bf16.msra.mxu0 %v755_v11  ;;  %v836_v1 = vld [vmem:[#allocation2 + $0xf0] ss:$8 sps:$4 sm:$0xff]   ;;  %v77_v3 = vshrl.u32 %v76_v2, 7  ;;  %v73_v4 = vld [vmem:[%s1046_s2] sm:$0x3] }
  0x29   :  { %276 = vmatprep.subr.bf16.mxu0 %v756_v12  ;;  %v74_v5 = vunpack.c.l.bf16 %v73_v4 }
  0x2a   :  { %604 = vmatpush1.bf16.msra.mxu1 %v803_v31  ;;  %v78_v6 = vsub.s32 0, %v77_v3  ;;  %v82_v7 = vsub.s32 2, %v77_v3 }
  0x2b   :  { %605 = vmatprep.subr.bf16.mxu1 %v804_v33 }
  0x2c   :  { %277 = vmatpush1.bf16.msra.mxu0 %v758_v13  ;;  %v79_v8 = vrot.slane %v74_v5, %v78_v6  ;;  %v83_v9 = vrot.slane %v74_v5, %v82_v7 }
  0x2d   :  { %278 = vmatprep.subr.bf16.mxu0 %v759_v14 }
  0x2e   :  { %606 = vmatpush1.bf16.msra.mxu1 %v806_v35  ;;  %v89_v10 = vrot.slane %v79_v8, %v78_v6  ;;  %v93_v11 = vrot.slane %v83_v9, %v78_v6 }
  0x2f   :  { %607 = vmatprep.subr.bf16.mxu1 %v807_v37 }
  0x30   :  { %279 = vmatpush1.bf16.msra.mxu0 %v761_v20 }
  0x31   :  { %280 = vmatprep.subr.bf16.mxu0 %v762_v22 }
  0x32   :  { %608 = vmatpush1.bf16.msra.mxu1 %v809_v39 }
  0x33   :  { %609 = vmatprep.subr.bf16.mxu1 %v810_v41 }
  0x34   :  { %281 = vmatpush1.bf16.msra.mxu0 %v764_v24 }
  0x35   :  { %282 = vmatprep.subr.bf16.mxu0 %v765_v26  ;;  %v414_v26 = vld [vmem:[%s1049_s5] sm:$0x3] }
  0x36   :  { %610 = vmatpush1.bf16.msra.mxu1 %v812_v43  ;;  %v415_v27 = vunpack.c.l.bf16 %v414_v26 }
  0x37   :  { %611 = vmatprep.subr.bf16.mxu1 %v813_v45 }
  0x38   :  { %283 = vmatpush1.bf16.msra.mxu0 %v767_v28  ;;  %v420_v28 = vrot.slane %v415_v27, %v78_v6 }
  0x39   :  { %284 = vmatprep.subr.bf16.mxu0 %v768_v30  ;;  %v424_v30 = vrot.slane %v415_v27, %v82_v7 }
  0x3a   :  { %612 = vmatpush1.bf16.msra.mxu1 %v815_v47 }
  0x3b   :  { %613 = vmatprep.subr.bf16.mxu1 %v816_v49  ;;  %v434_v33 = vrot.slane %v424_v30, %v78_v6 }
  0x3c   :  { %285 = vmatpush1.bf16.msra.mxu0 %v770_v32  ;;  %v430_v32 = vrot.slane %v420_v28, %v78_v6 }
  0x3d   :  { %286 = vmatprep.subr.bf16.mxu0 %v771_v34 }
  0x3e   :  { %614 = vmatpush1.bf16.msra.mxu1 %v818_v51 }
  0x3f   :  { %615 = vmatprep.subr.bf16.mxu1 %v819_v53 }
  0x40   :  { %287 = vmatpush1.bf16.msra.mxu0 %v773_v36 }
  0x41   :  { %288 = vmatprep.subr.bf16.mxu0 %v774_v38 }
  0x42   :  { %616 = vmatpush1.bf16.msra.mxu1 %v821_v55 }
  0x43   :  { %617 = vmatprep.subr.bf16.mxu1 %v822_v56 }
  0x44   :  { %289 = vmatpush1.bf16.msra.mxu0 %v776_v40 }
  0x45   :  { %290 = vmatprep.subr.bf16.mxu0 %v777_v42  ;;  %v868_v42 = vmov 1966171168  }
  0x46   :  { %618 = vmatpush1.bf16.msra.mxu1 %v824_v57  ;;  %v341_v43 = vunpack.c.l.s4 %v868_v42 }
  0x47   :  { %619 = vmatprep.subr.bf16.mxu1 %v825_v58 }
  0x48   :  { %291 = vmatpush1.bf16.msra.mxu0 %v779_v44  ;;  %v342_v47 = vunpack.c.0.s8 %v341_v43 }
  0x49   :  { %292 = vmatprep.subr.bf16.mxu0 %v780_v46 }
  0x4a   :  { %620 = vmatpush1.bf16.msra.mxu1 %v827_v59 }
  0x4b   :  { %621 = vmatprep.subr.bf16.mxu1 %v828_v60 }
  0x4c   :  { %293 = vmatpush1.bf16.msra.mxu0 %v782_v48  ;;  %v695_v48 = vld.sshfl [vmem:[%s1047_s3] sm:$0x11 pattern:$0x75316420] }
  0x4d   :  { %294 = vmatprep.subr.bf16.mxu0 %v783_v50  ;;  %v339_v51 = vcombine.high %v695_v48, %v695_v48 }
  0x4e   :  { %622 = vmatpush1.bf16.msra.mxu1 %v830_v61 }
  0x4f   :  { %623 = vmatprep.subr.bf16.mxu1 %v831_v62 }
  0x50   :  { %295 = vmatpush1.bf16.msra.mxu0 %v785_v52  ;;  %v345_v52 = vsub.s32 %v342_v47, %v77_v3 }
  0x52   :  { %624 = vmatpush1.bf16.msra.mxu1 %v833_v63  ;;  %v353_v55 = vrot.slane %v339_v51, %v345_v52 }
  0x53   :  { %297 = vmatmul.mubr.bf16.vlgmr.msra.gmra.mrb[0].mxu0 %v786_v54  ;;  %625 = vmatprep.subr.bf16.mxu1 %v834_v0 }
  0x54   :  { %v362_v57 = vpack.i.b16 %v353_v55, %v353_v55 }
  0x56   :  { %626 = vmatpush1.bf16.msra.mxu1 %v836_v1  ;;  %v367_v61 = vrot.slane %v362_v57, %v78_v6 }
  0x59   :  { %628 = vmatmul.mubr.bf16.vlgmr.msra.gmra.mrb[0].mxu1 %v786_v54  ;;  %v346_v54 = vrot.slane %v695_v48, %v345_v52 }
  0x5b   :  { %v355_v56 = vpack.i.b16 %v346_v54, %v346_v54 }
  0x5d   :  { %v360_v60 = vrot.slane %v355_v56, %v78_v6 }
 0x126   :  { %v298_v12 = vpop.f32.mrb[0].mxu0 }
 0x127   :  { %v299_v13 = vadd.f32 %v298_v12, %v89_v10  ;;  %v300_v14 = vpop.f32.mrb[1].mxu0 }
 0x128   :  { %v301_v15 = vadd.f32 %v300_v14, %v93_v11  ;;  %v302_v16 = vpop.f32.mrb[2].mxu0 }
 0x129   :  { %v303_v17 = vadd.f32 %v302_v16, %v89_v10  ;;  %v304_v18 = vpop.f32.mrb[3].mxu0  ;;  %v307_v19 = vmul.f32 %v299_v13, %v299_v13 }
 0x12a   :  { %v305_v20 = vadd.f32 %v304_v18, %v93_v11  ;;  %v308_v21 = vmul.f32 %v301_v15, %v301_v15 }
 0x12b   :  { %v309_v22 = vmul.f32 %v303_v17, %v303_v17 }
 0x12c   :  { %v310_v23 = vmul.f32 %v305_v20, %v305_v20  ;;  %v311_v24 = vadd.f32 %v308_v21, %v307_v19  ;;  %v629_v29 = vpop.f32.mrb[0].mxu1 }
 0x12d   :  { %v631_v31 = vpop.f32.mrb[1].mxu1  ;;  %v630_v36 = vadd.f32 %v629_v29, %v430_v32 }
 0x12e   :  { %312 = vadd.xlane.f32.xlu0 %v311_v24  ;;  %v314_v25 = vadd.f32 %v310_v23, %v309_v22  ;;  %v633_v34 = vpop.f32.mrb[2].mxu1  ;;  %v632_v37 = vadd.f32 %v631_v31, %v434_v33 }
 0x12f   :  { %v635_v35 = vpop.f32.mrb[3].mxu1  ;;  %v634_v38 = vadd.f32 %v633_v34, %v430_v32 }
 0x130   :  { %v636_v39 = vadd.f32 %v635_v35, %v434_v33  ;;  %v732_v40 = vpack.c.bf16 %v632_v37, %v630_v36 }
 0x132   :  { %315 = vadd.xlane.f32.xlu0 %v314_v25  ;;  %v733_v41 = vpack.c.bf16 %v636_v39, %v634_v38  ;;  %650 = vst [vmem:[%s1051_s7] sm:$0xff] %v732_v40 }
 0x134   :  { %651 = vst [vmem:[%s1051_s7 + $0x8] sm:$0xff] %v733_v41 }
 0x1bb   :  { %v313_v44 = vpop.xlane.xlu0 %312 }
 0x1bc   :  { %v318_v45 = vmul.f32 0.00390625, %v313_v44 }
 0x1be   :  { %v320_v46 = vadd.f32 1e-06, %v318_v45 }
 0x1bf   :  { %v316_v49 = vpop.xlane.xlu0 %315 }
 0x1c0   :  { %v319_v50 = vmul.f32 0.00390625, %v316_v49  ;;  %837 = vrsqrt.f32 %v320_v46 }
 0x1c2   :  { %v321_v53 = vadd.f32 1e-06, %v319_v50 }
 0x1c4   :  { %839 = vrsqrt.f32 %v321_v53 }
 0x1ca   :  { %v838_v58 = vpop.eup %837 }
 0x1cb   :  { %v324_v62 = vmul.f32 %v838_v58, %v299_v13  ;;  %v325_v63 = vmul.f32 %v838_v58, %v301_v15 }
 0x1ce   :  { %v840_v59 = vpop.eup %839 }
 0x1cf   :  { %v326_v0 = vmul.f32 %v840_v59, %v303_v17  ;;  %v327_v1 = vmul.f32 %v840_v59, %v305_v20 }
 0x1d1   :  { %v328_v2 = vpack.c.bf16 %v326_v0, %v324_v62  ;;  %v329_v4 = vpack.c.bf16 %v327_v1, %v325_v63 }
 0x1d3   :  { %v368_v5 = vmul.bf16 %v360_v60, %v328_v2  ;;  %v369_v7 = vmul.bf16 %v367_v61, %v329_v4 }
 0x1d5   :  { %v696_v8 = vcombine.low %v368_v5, %v369_v7  ;;  %v697_v3 = vcombine.high %v368_v5, %v369_v7 }
 0x1d7   :  { %380 = vst [vmem:[%s1050_s6] sm:$0xff] %v696_v8  ;;  %381 = vst [vmem:[%s1050_s6 + $0x8] sm:$0xff] %v697_v3 }
 0x1d8   :  { %660 = vsyncpa [#allocation3], 1 }

</bundles_post_ra>
